<compile_context>
chip_gen: v5e
topology: v5e:2x2
jax: 0.10.0
libtpu: 0.0.40
codegen_flags: <defaults>
</compile_context>

<pallas_src>
import functools
import numpy as np

import jax
import jax.numpy as jnp
from jax.experimental import pallas as pl
from jax.experimental.pallas import tpu as pltpu


LANE = 128


def _ru128(x):
    return ((x + LANE - 1) // LANE) * LANE


def _layout(H, F, dim_y):
    """Lane-aligned (multiple-of-128) column offsets for the packed weight slab."""
    gH, gF, gY = _ru128(H), _ru128(F), _ru128(dim_y)
    # block 1 (rows 0:H, input = h_prev): [Whh_r | Whh_z | Whh_n | Wk | Wb]
    w1 = dict(r=0, z=gH, n=2 * gH, k=3 * gH, b=3 * gH + gF, width=3 * gH + gF + LANE)
    # block 2 (rows 0:F, input = r): [Wih_r | Wih_z | Wih_n]
    ih = dict(r=0, z=gH, n=2 * gH, width=3 * gH)
    # block 3 (rows 0:H, input = h_new): [We | Wv | Wfcn]
    w2 = dict(e=0, v=gF, a=2 * gF, width=2 * gF + gY)
    return w1, ih, w2


def _softplus(x):
    # numerically stable softplus; beta = softplus(x) + 1 equals the original
    # clamp/exp/log1p construction in tracking.py exactly.
    return jnp.log1p(jnp.exp(-jnp.abs(x))) + jnp.maximum(x, 0.0)


# ----------------------------------------------------------------------------
# Fused kernel: hoisted projections + sequential NTMCell loop + output head
# ----------------------------------------------------------------------------
def ntm_fused_kernel(n_objects, H, F, dim_y,
                     h_prev_ref, C_ref, W_ref, b_ref, out_ref):
    eps = 1e-8
    N = C_ref.shape[0]
    w1l, ihl, w2l = _layout(H, F, dim_y)
    base1 = 0
    base_ih = w1l['width']
    base2 = base_ih + ihl['width']

    # ---- hoisted, loop-invariant projection of h_prev (all objects at once) ----
    h2 = h_prev_ref[...]                                          # (O*N, H) object-major
    W1 = W_ref[0:H, base1:base1 + w1l['width']]
    b1 = b_ref[:, base1:base1 + w1l['width']]
    proj = jnp.dot(h2, W1, preferred_element_type=jnp.float32) + b1   # (O*N, 5*128)

    WihT = W_ref[0:F, base_ih:base_ih + ihl['width']]             # (F, 3*128)
    bih = b_ref[:, base_ih:base_ih + ihl['width']]
    W2 = W_ref[0:H, base2:base2 + w2l['width']]                   # (H, 3*128)
    b2 = b_ref[:, base2:base2 + w2l['width']]

    C = C_ref[...]                                                # (N, M, F), sequential carry

    for i in range(n_objects):   # small static unroll; only C is carried object->object
        lo = i * N
        h_prev = h2[lo:lo + N]                                    # (N, H)
        # lane-aligned segment picks (offsets are multiples of 128)
        gh_r = proj[lo:lo + N, w1l['r']:w1l['r'] + H]
        gh_z = proj[lo:lo + N, w1l['z']:w1l['z'] + H]
        gh_n = proj[lo:lo + N, w1l['n']:w1l['n'] + H]
        k = proj[lo:lo + N, w1l['k']:w1l['k'] + F]                # (N, F)
        beta = _softplus(proj[lo:lo + N, w1l['b']:w1l['b'] + 1]) + 1.0   # (N, 1)

        # --- cosine similarity(C, k) along features (eps = 1e-8) ---
        # VPU multiply + lane reduce; no MXU round-trip on the serial chain.
        dot_ck = jnp.sum(C * k[:, None, :], axis=-1)              # (N, M)
        c_sq = jnp.sum(C * C, axis=2)                             # (N, M)
        k_sq = jnp.sum(k * k, axis=1, keepdims=True)              # (N, 1)
        s = (dot_ck
             * jax.lax.rsqrt(jnp.maximum(c_sq, eps * eps))
             * jax.lax.rsqrt(jnp.maximum(k_sq, eps * eps)))

        # --- softmax(s * beta) over memory slots ---
        logits = s * beta
        logits = logits - jnp.max(logits, axis=1, keepdims=True)
        el = jnp.exp(logits)
        w = el / jnp.sum(el, axis=1, keepdims=True)               # (N, M)

        # --- read memory: r = w @ C (VPU multiply + sublane reduce) ---
        r = jnp.sum(w[:, :, None] * C, axis=1)                    # (N, F)

        # --- GRUCell(r, h_prev), PyTorch gate order (r, z, n) ---
        gi = jnp.dot(r, WihT, preferred_element_type=jnp.float32) + bih   # (N, 3*128)
        r_g = jax.nn.sigmoid(gi[:, ihl['r']:ihl['r'] + H] + gh_r)
        z_g = jax.nn.sigmoid(gi[:, ihl['z']:ihl['z'] + H] + gh_z)
        n_g = jnp.tanh(gi[:, ihl['n']:ihl['n'] + H] + r_g * gh_n)
        h_new = (1.0 - z_g) * n_g + z_g * h_prev                  # (N, H)

        # --- fused erase / add / output-head projection of h_new ---
        eva = jnp.dot(h_new, W2, preferred_element_type=jnp.float32) + b2
        e = jax.nn.sigmoid(eva[:, w2l['e']:w2l['e'] + F])
        v = eva[:, w2l['v']:w2l['v'] + F]
        a = eva[:, w2l['a']:w2l['a'] + dim_y]

        # --- write memory ---
        we = w[:, :, None] * e[:, None, :]                        # (N, M, F)
        wv = w[:, :, None] * v[:, None, :]
        C = C * (1.0 - we) + wv

        # merged output, written directly in final (N, O, .) layout
        out_ref[:, i, 0:H] = h_new
        out_ref[:, i, H:H + dim_y] = a


# ----------------------------------------------------------------------------
# Parameter init (deterministic, mirrors the PyTorch shapes / xavier_normal_)
# ----------------------------------------------------------------------------
def _xavier_normal(key, shape):
    fan_out, fan_in = shape
    std = float(np.sqrt(2.0 / (fan_in + fan_out)))
    return std * jax.random.normal(key, shape, dtype=jnp.float32)


def _bias(key, fan_in, n):
    bound = 1.0 / float(np.sqrt(fan_in))
    return jax.random.uniform(key, (1, n), jnp.float32, -bound, bound)


def init_params(key, dims):
    H = dims['tracker_state']
    F = dims['features']
    dim_y = (dims['confidence'] + dims['layer'] + dims['pose']
             + dims['shape'] + dims['appearance'])
    ks = jax.random.split(key, 14)
    return {
        'Wk': _xavier_normal(ks[0], (F, H)),      'bk': _bias(ks[1], H, F),
        'Wb': _xavier_normal(ks[2], (1, H)),      'bb': _bias(ks[3], H, 1),
        'We': _xavier_normal(ks[4], (F, H)),      'be': _bias(ks[5], H, F),
        'Wv': _xavier_normal(ks[6], (F, H)),      'bv': _bias(ks[7], H, F),
        'Wih': _xavier_normal(ks[8], (3 * H, F)), 'bih': _bias(ks[9], H, 3 * H),
        'Whh': _xavier_normal(ks[10], (3 * H, H)), 'bhh': _bias(ks[11], H, 3 * H),
        'Wfcn': _xavier_normal(ks[12], (dim_y, H)), 'bfcn': _bias(ks[13], H, dim_y),
    }


def prepare_params(params, dims):
    """One-time transpose + lane-aligned packing of all weights into one slab."""
    H = dims['tracker_state']
    F = dims['features']
    dim_y = (dims['confidence'] + dims['layer'] + dims['pose']
             + dims['shape'] + dims['appearance'])
    w1l, ihl, w2l = _layout(H, F, dim_y)
    base1 = 0
    base_ih = w1l['width']
    base2 = base_ih + ihl['width']
    total = base2 + w2l['width']
    R = max(H, F)

    W = jnp.zeros((R, total), jnp.float32)
    b = jnp.zeros((1, total), jnp.float32)

    Whh, bhh = params['Whh'], params['bhh']
    Wih, bih = params['Wih'], params['bih']

    # block 1: hidden-side GRU gates + attention key + sharpness (input h_prev)
    W = W.at[0:H, base1 + w1l['r']:base1 + w1l['r'] + H].set(Whh[0:H].T)
    W = W.at[0:H, base1 + w1l['z']:base1 + w1l['z'] + H].set(Whh[H:2 * H].T)
    W = W.at[0:H, base1 + w1l['n']:base1 + w1l['n'] + H].set(Whh[2 * H:3 * H].T)
    W = W.at[0:H, base1 + w1l['k']:base1 + w1l['k'] + F].set(params['Wk'].T)
    W = W.at[0:H, base1 + w1l['b']:base1 + w1l['b'] + 1].set(params['Wb'].T)
    b = b.at[:, base1 + w1l['r']:base1 + w1l['r'] + H].set(bhh[:, 0:H])
    b = b.at[:, base1 + w1l['z']:base1 + w1l['z'] + H].set(bhh[:, H:2 * H])
    b = b.at[:, base1 + w1l['n']:base1 + w1l['n'] + H].set(bhh[:, 2 * H:3 * H])
    b = b.at[:, base1 + w1l['k']:base1 + w1l['k'] + F].set(params['bk'])
    b = b.at[:, base1 + w1l['b']:base1 + w1l['b'] + 1].set(params['bb'])

    # block 2: input-side GRU gates (input r, rows 0:F)
    W = W.at[0:F, base_ih + ihl['r']:base_ih + ihl['r'] + H].set(Wih[0:H].T)
    W = W.at[0:F, base_ih + ihl['z']:base_ih + ihl['z'] + H].set(Wih[H:2 * H].T)
    W = W.at[0:F, base_ih + ihl['n']:base_ih + ihl['n'] + H].set(Wih[2 * H:3 * H].T)
    b = b.at[:, base_ih + ihl['r']:base_ih + ihl['r'] + H].set(bih[:, 0:H])
    b = b.at[:, base_ih + ihl['z']:base_ih + ihl['z'] + H].set(bih[:, H:2 * H])
    b = b.at[:, base_ih + ihl['n']:base_ih + ihl['n'] + H].set(bih[:, 2 * H:3 * H])

    # block 3: erase / add / output head (input h_new)
    W = W.at[0:H, base2 + w2l['e']:base2 + w2l['e'] + F].set(params['We'].T)
    W = W.at[0:H, base2 + w2l['v']:base2 + w2l['v'] + F].set(params['Wv'].T)
    W = W.at[0:H, base2 + w2l['a']:base2 + w2l['a'] + dim_y].set(params['Wfcn'].T)
    b = b.at[:, base2 + w2l['e']:base2 + w2l['e'] + F].set(params['be'])
    b = b.at[:, base2 + w2l['v']:base2 + w2l['v'] + F].set(params['bv'])
    b = b.at[:, base2 + w2l['a']:base2 + w2l['a'] + dim_y].set(params['bfcn'])

    return {'W': W, 'b': b}


# ----------------------------------------------------------------------------
# Wrapper: NTM.forward(h_o_prev, y_e_prev, C_o, T)
# ----------------------------------------------------------------------------
def ntm_forward(prep, h_o_prev, y_e_prev, C_o, T, *, n_objects, dims):
    del y_e_prev, T  # unused by the reference forward
    N, O, H = h_o_prev.shape
    _, M, F = C_o.shape
    assert O == n_objects
    conf_dim, layer_dim, pose_dim, shape_dim, app_dim = (
        dims['confidence'], dims['layer'], dims['pose'], dims['shape'], dims['appearance'])
    dim_y = conf_dim + layer_dim + pose_dim + shape_dim + app_dim

    # object-major flattening so per-object slices inside the kernel are contiguous rows
    h2 = jnp.transpose(h_o_prev, (1, 0, 2)).reshape(O * N, H)

    vmem = pl.BlockSpec(memory_space=pltpu.MemorySpace.VMEM)
    kern = functools.partial(ntm_fused_kernel, n_objects, H, F, dim_y)
    out = pl.pallas_call(
        kern,
        out_shape=jax.ShapeDtypeStruct((N, O, H + dim_y), jnp.float32),
        in_specs=[vmem] * 4,
        out_specs=vmem,
    )(h2, C_o, prep['W'], prep['b'])
    # NOTE: the updated external memory C is a kernel-internal carry; the reference
    # NTM.forward does not return it, so it is intentionally not emitted.

    h_o = out[..., 0:H]                                   # (N, O, H) -- already final layout
    a = out[..., H:H + dim_y]                             # (N, O, dim_y)

    o0 = 0
    a_e = a[..., o0:o0 + conf_dim]; o0 += conf_dim
    a_l = a[..., o0:o0 + layer_dim]; o0 += layer_dim
    a_p = a[..., o0:o0 + pose_dim]; o0 += pose_dim
    a_s = a[..., o0:o0 + shape_dim]; o0 += shape_dim
    a_a = a[..., o0:]

    y_e = a_e
    # y_l: softmax -> straight-through hard one-hot (forward value; first-index tie-break).
    # TODO(synk): ut.STGumbelSoftmax adds Gumbel noise during training; noiseless hard
    # argmax here (and no ST gradient construction) -- inference-only forward.
    y_l = jax.nn.one_hot(jnp.argmax(a_l, axis=-1), layer_dim, dtype=jnp.float32)
    y_p = a_p
    # Y_s: sigmoid -> straight-through hard threshold at 0.5 (i.e. a_s > 0).
    # TODO(synk): ut.STGumbelSigmoid Gumbel noise omitted (deterministic forward).
    Y_s = (a_s > 0.0).astype(jnp.float32)
    Y_a = a_a

    return h_o, y_e, y_l, y_p, Y_s, Y_a


# ----------------------------------------------------------------------------
if __name__ == "__main__":
    dims = dict(confidence=1, layer=3, pose=4, shape=8, appearance=16,
                tracker_state=32, features=16)
    n_objects = 3
    N, M = 2, 8
    H, F = dims['tracker_state'], dims['features']

    key = jax.random.PRNGKey(0)
    k_params, k_h, k_c, k_y = jax.random.split(key, 4)
    params = init_params(k_params, dims)
    prep = prepare_params(params, dims)      # weight transposes/packing done once

    h_o_prev = jax.random.normal(k_h, (N, n_objects, H), dtype=jnp.float32)
    C_o = jax.random.normal(k_c, (N, M, F), dtype=jnp.float32)
    y_e_prev = jax.random.normal(k_y, (N, n_objects, dims['confidence']), dtype=jnp.float32)
    T = 0

    fwd = jax.jit(functools.partial(ntm_forward, n_objects=n_objects, dims=dims))
    outs = fwd(prep, h_o_prev, y_e_prev, C_o, T)
    jax.block_until_ready(outs)
    print("KERNEL_OK")
</pallas_src>

<mosaic_0001>
module attributes {stable_mosaic.version = 11 : i64} {
  func.func @ntm_fused_kernel(%arg0: memref<6x32xf32, #tpu.memory_space<vmem>>, %arg1: memref<2x8x16xf32, #tpu.memory_space<vmem>>, %arg2: memref<32x1408xf32, #tpu.memory_space<vmem>>, %arg3: memref<1x1408xf32, #tpu.memory_space<vmem>>, %arg4: memref<2x3x64xf32, #tpu.memory_space<vmem>>) attributes {dimension_semantics = [], scalar_prefetch = 0 : i64, scratch_operands = 0 : i64, tpu.core_type = #tpu.core_type<tc>} {
    %c0 = arith.constant 0 : index
    %c0_0 = arith.constant 0 : index
    %0 = vector.load %arg0[%c0, %c0_0] : memref<6x32xf32, #tpu.memory_space<vmem>>, vector<6x32xf32>
    %c0_1 = arith.constant 0 : index
    %c0_2 = arith.constant 0 : index
    %1 = vector.load %arg2[%c0_1, %c0_2] : memref<32x1408xf32, #tpu.memory_space<vmem>>, vector<32x640xf32>
    %c0_3 = arith.constant 0 : index
    %c0_4 = arith.constant 0 : index
    %2 = vector.load %arg3[%c0_3, %c0_4] : memref<1x1408xf32, #tpu.memory_space<vmem>>, vector<1x640xf32>
    %cst = arith.constant dense<0.000000e+00> : vector<6x640xf32>
    %3 = tpu.matmul %0, %1, %cst {dimension_numbers = #tpu.dot_dimension_numbers<[1], [0], [0], [1], [0, 0, 1, 1], [], []>} : vector<6x32xf32>, vector<32x640xf32>, vector<6x640xf32> -> vector<6x640xf32>
    %4 = vector.broadcast %2 : vector<1x640xf32> to vector<6x640xf32>
    %5 = arith.addf %3, %4 : vector<6x640xf32>
    %c0_5 = arith.constant 0 : index
    %c640 = arith.constant 640 : index
    %6 = vector.load %arg2[%c0_5, %c640] : memref<32x1408xf32, #tpu.memory_space<vmem>>, vector<16x384xf32>
    %c0_6 = arith.constant 0 : index
    %c640_7 = arith.constant 640 : index
    %7 = vector.load %arg3[%c0_6, %c640_7] : memref<1x1408xf32, #tpu.memory_space<vmem>>, vector<1x384xf32>
    %c0_8 = arith.constant 0 : index
    %c1024 = arith.constant 1024 : index
    %8 = vector.load %arg2[%c0_8, %c1024] : memref<32x1408xf32, #tpu.memory_space<vmem>>, vector<32x384xf32>
    %c0_9 = arith.constant 0 : index
    %c1024_10 = arith.constant 1024 : index
    %9 = vector.load %arg3[%c0_9, %c1024_10] : memref<1x1408xf32, #tpu.memory_space<vmem>>, vector<1x384xf32>
    %c0_11 = arith.constant 0 : index
    %c0_12 = arith.constant 0 : index
    %c0_13 = arith.constant 0 : index
    %10 = vector.load %arg1[%c0_11, %c0_12, %c0_13] : memref<2x8x16xf32, #tpu.memory_space<vmem>>, vector<2x8x16xf32>
    %11 = vector.extract_strided_slice %0 {offsets = [0, 0], sizes = [2, 32], strides = [1, 1]} : vector<6x32xf32> to vector<2x32xf32>
    %12 = vector.extract_strided_slice %5 {offsets = [0, 0], sizes = [2, 32], strides = [1, 1]} : vector<6x640xf32> to vector<2x32xf32>
    %13 = vector.extract_strided_slice %5 {offsets = [0, 128], sizes = [2, 32], strides = [1, 1]} : vector<6x640xf32> to vector<2x32xf32>
    %14 = vector.extract_strided_slice %5 {offsets = [0, 256], sizes = [2, 32], strides = [1, 1]} : vector<6x640xf32> to vector<2x32xf32>
    %15 = vector.extract_strided_slice %5 {offsets = [0, 384], sizes = [2, 16], strides = [1, 1]} : vector<6x640xf32> to vector<2x16xf32>
    %16 = vector.extract_strided_slice %5 {offsets = [0, 512], sizes = [2, 1], strides = [1, 1]} : vector<6x640xf32> to vector<2x1xf32>
    %17 = math.absf %16 : vector<2x1xf32>
    %cst_14 = arith.constant 0.000000e+00 : f32
    %18 = vector.broadcast %cst_14 : f32 to vector<2x1xf32>
    %19 = arith.subf %18, %17 : vector<2x1xf32>
    %20 = math.exp %19 : vector<2x1xf32>
    %21 = math.log1p %20 : vector<2x1xf32>
    %cst_15 = arith.constant 0.000000e+00 : f32
    %22 = vector.broadcast %cst_15 : f32 to vector<2x1xf32>
    %23 = arith.maximumf %16, %22 : vector<2x1xf32>
    %24 = arith.addf %21, %23 : vector<2x1xf32>
    %cst_16 = arith.constant 1.000000e+00 : f32
    %25 = vector.broadcast %cst_16 : f32 to vector<2x1xf32>
    %26 = arith.addf %24, %25 : vector<2x1xf32>
    %27 = vector.shape_cast %15 : vector<2x16xf32> to vector<2x1x16xf32>
    %28 = vector.broadcast %27 : vector<2x1x16xf32> to vector<2x8x16xf32>
    %29 = arith.mulf %10, %28 : vector<2x8x16xf32>
    %cst_17 = arith.constant dense<0.000000e+00> : vector<2x8xf32>
    %30 = vector.multi_reduction <add>, %29, %cst_17 [2] : vector<2x8x16xf32> to vector<2x8xf32>
    %31 = arith.mulf %10, %10 : vector<2x8x16xf32>
    %cst_18 = arith.constant dense<0.000000e+00> : vector<2x8xf32>
    %32 = vector.multi_reduction <add>, %31, %cst_18 [2] : vector<2x8x16xf32> to vector<2x8xf32>
    %33 = arith.mulf %15, %15 : vector<2x16xf32>
    %cst_19 = arith.constant dense<0.000000e+00> : vector<2xf32>
    %34 = vector.multi_reduction <add>, %33, %cst_19 [1] : vector<2x16xf32> to vector<2xf32>
    %35 = vector.shape_cast %34 : vector<2xf32> to vector<2x1xf32>
    %cst_20 = arith.constant 1.000000e-16 : f32
    %36 = vector.broadcast %cst_20 : f32 to vector<2x8xf32>
    %37 = arith.maximumf %32, %36 : vector<2x8xf32>
    %38 = math.rsqrt %37 : vector<2x8xf32>
    %39 = arith.mulf %30, %38 : vector<2x8xf32>
    %cst_21 = arith.constant 1.000000e-16 : f32
    %40 = vector.broadcast %cst_21 : f32 to vector<2x1xf32>
    %41 = arith.maximumf %35, %40 : vector<2x1xf32>
    %42 = math.rsqrt %41 : vector<2x1xf32>
    %43 = vector.broadcast %42 : vector<2x1xf32> to vector<2x8xf32>
    %44 = arith.mulf %39, %43 : vector<2x8xf32>
    %45 = vector.broadcast %26 : vector<2x1xf32> to vector<2x8xf32>
    %46 = arith.mulf %44, %45 : vector<2x8xf32>
    %cst_22 = arith.constant dense<0xFF800000> : vector<2xf32>
    %47 = vector.multi_reduction <maximumf>, %46, %cst_22 [1] : vector<2x8xf32> to vector<2xf32>
    %48 = vector.shape_cast %47 : vector<2xf32> to vector<2x1xf32>
    %49 = vector.broadcast %48 : vector<2x1xf32> to vector<2x8xf32>
    %50 = arith.subf %46, %49 : vector<2x8xf32>
    %51 = math.exp %50 : vector<2x8xf32>
    %cst_23 = arith.constant dense<0.000000e+00> : vector<2xf32>
    %52 = vector.multi_reduction <add>, %51, %cst_23 [1] : vector<2x8xf32> to vector<2xf32>
    %53 = vector.shape_cast %52 : vector<2xf32> to vector<2x1xf32>
    %54 = vector.broadcast %53 : vector<2x1xf32> to vector<2x8xf32>
    %55 = arith.divf %51, %54 : vector<2x8xf32>
    %56 = vector.shape_cast %55 : vector<2x8xf32> to vector<2x8x1xf32>
    %57 = vector.broadcast %56 : vector<2x8x1xf32> to vector<2x8x16xf32>
    %58 = arith.mulf %57, %10 : vector<2x8x16xf32>
    %cst_24 = arith.constant dense<0.000000e+00> : vector<2x16xf32>
    %59 = vector.multi_reduction <add>, %58, %cst_24 [1] : vector<2x8x16xf32> to vector<2x16xf32>
    %cst_25 = arith.constant dense<0.000000e+00> : vector<2x384xf32>
    %60 = tpu.matmul %59, %6, %cst_25 {dimension_numbers = #tpu.dot_dimension_numbers<[1], [0], [0], [1], [0, 0, 1, 1], [], []>} : vector<2x16xf32>, vector<16x384xf32>, vector<2x384xf32> -> vector<2x384xf32>
    %61 = vector.broadcast %7 : vector<1x384xf32> to vector<2x384xf32>
    %62 = arith.addf %60, %61 : vector<2x384xf32>
    %63 = vector.extract_strided_slice %62 {offsets = [0, 0], sizes = [2, 32], strides = [1, 1]} : vector<2x384xf32> to vector<2x32xf32>
    %64 = arith.addf %63, %12 : vector<2x32xf32>
    %65 = arith.negf %64 : vector<2x32xf32>
    %66 = math.exp %65 : vector<2x32xf32>
    %cst_26 = arith.constant 1.000000e+00 : f32
    %67 = vector.broadcast %cst_26 : f32 to vector<2x32xf32>
    %68 = arith.addf %67, %66 : vector<2x32xf32>
    %69 = arith.divf %67, %68 : vector<2x32xf32>
    %70 = vector.extract_strided_slice %62 {offsets = [0, 128], sizes = [2, 32], strides = [1, 1]} : vector<2x384xf32> to vector<2x32xf32>
    %71 = arith.addf %70, %13 : vector<2x32xf32>
    %72 = arith.negf %71 : vector<2x32xf32>
    %73 = math.exp %72 : vector<2x32xf32>
    %cst_27 = arith.constant 1.000000e+00 : f32
    %74 = vector.broadcast %cst_27 : f32 to vector<2x32xf32>
    %75 = arith.addf %74, %73 : vector<2x32xf32>
    %76 = arith.divf %74, %75 : vector<2x32xf32>
    %77 = vector.extract_strided_slice %62 {offsets = [0, 256], sizes = [2, 32], strides = [1, 1]} : vector<2x384xf32> to vector<2x32xf32>
    %78 = arith.mulf %69, %14 : vector<2x32xf32>
    %79 = arith.addf %77, %78 : vector<2x32xf32>
    %80 = math.tanh %79 : vector<2x32xf32>
    %cst_28 = arith.constant 1.000000e+00 : f32
    %81 = vector.broadcast %cst_28 : f32 to vector<2x32xf32>
    %82 = arith.subf %81, %76 : vector<2x32xf32>
    %83 = arith.mulf %82, %80 : vector<2x32xf32>
    %84 = arith.mulf %76, %11 : vector<2x32xf32>
    %85 = arith.addf %83, %84 : vector<2x32xf32>
    %cst_29 = arith.constant dense<0.000000e+00> : vector<2x384xf32>
    %86 = tpu.matmul %85, %8, %cst_29 {dimension_numbers = #tpu.dot_dimension_numbers<[1], [0], [0], [1], [0, 0, 1, 1], [], []>} : vector<2x32xf32>, vector<32x384xf32>, vector<2x384xf32> -> vector<2x384xf32>
    %87 = vector.broadcast %9 : vector<1x384xf32> to vector<2x384xf32>
    %88 = arith.addf %86, %87 : vector<2x384xf32>
    %89 = vector.extract_strided_slice %88 {offsets = [0, 0], sizes = [2, 16], strides = [1, 1]} : vector<2x384xf32> to vector<2x16xf32>
    %90 = arith.negf %89 : vector<2x16xf32>
    %91 = math.exp %90 : vector<2x16xf32>
    %cst_30 = arith.constant 1.000000e+00 : f32
    %92 = vector.broadcast %cst_30 : f32 to vector<2x16xf32>
    %93 = arith.addf %92, %91 : vector<2x16xf32>
    %94 = arith.divf %92, %93 : vector<2x16xf32>
    %95 = vector.extract_strided_slice %88 {offsets = [0, 128], sizes = [2, 16], strides = [1, 1]} : vector<2x384xf32> to vector<2x16xf32>
    %96 = vector.extract_strided_slice %88 {offsets = [0, 256], sizes = [2, 32], strides = [1, 1]} : vector<2x384xf32> to vector<2x32xf32>
    %97 = vector.shape_cast %55 : vector<2x8xf32> to vector<2x8x1xf32>
    %98 = vector.shape_cast %94 : vector<2x16xf32> to vector<2x1x16xf32>
    %99 = vector.broadcast %97 : vector<2x8x1xf32> to vector<2x8x16xf32>
    %100 = vector.broadcast %98 : vector<2x1x16xf32> to vector<2x8x16xf32>
    %101 = arith.mulf %99, %100 : vector<2x8x16xf32>
    %102 = vector.shape_cast %55 : vector<2x8xf32> to vector<2x8x1xf32>
    %103 = vector.shape_cast %95 : vector<2x16xf32> to vector<2x1x16xf32>
    %104 = vector.broadcast %102 : vector<2x8x1xf32> to vector<2x8x16xf32>
    %105 = vector.broadcast %103 : vector<2x1x16xf32> to vector<2x8x16xf32>
    %106 = arith.mulf %104, %105 : vector<2x8x16xf32>
    %cst_31 = arith.constant 1.000000e+00 : f32
    %107 = vector.broadcast %cst_31 : f32 to vector<2x8x16xf32>
    %108 = arith.subf %107, %101 : vector<2x8x16xf32>
    %109 = arith.mulf %10, %108 : vector<2x8x16xf32>
    %110 = arith.addf %109, %106 : vector<2x8x16xf32>
    %c0_32 = arith.constant 0 : index
    %c0_33 = arith.constant 0 : index
    %c0_34 = arith.constant 0 : index
    %111 = vector.load %arg4[%c0_32, %c0_33, %c0_34] : memref<2x3x64xf32, #tpu.memory_space<vmem>>, vector<2x1x32xf32>
    %112 = vector.shape_cast %111 : vector<2x1x32xf32> to vector<2x32xf32>
    %113 = vector.shape_cast %85 : vector<2x32xf32> to vector<2x1x32xf32>
    tpu.vector_store %arg4[%c0_32, %c0_33, %c0_34], %113 {strides = array<i32>} : memref<2x3x64xf32, #tpu.memory_space<vmem>>, vector<2x1x32xf32>,
    %c0_35 = arith.constant 0 : index
    %c0_36 = arith.constant 0 : index
    %c32 = arith.constant 32 : index
    %114 = vector.load %arg4[%c0_35, %c0_36, %c32] : memref<2x3x64xf32, #tpu.memory_space<vmem>>, vector<2x1x32xf32>
    %115 = vector.shape_cast %114 : vector<2x1x32xf32> to vector<2x32xf32>
    %116 = vector.shape_cast %96 : vector<2x32xf32> to vector<2x1x32xf32>
    tpu.vector_store %arg4[%c0_35, %c0_36, %c32], %116 {strides = array<i32>} : memref<2x3x64xf32, #tpu.memory_space<vmem>>, vector<2x1x32xf32>,
    %117 = vector.extract_strided_slice %0 {offsets = [2, 0], sizes = [2, 32], strides = [1, 1]} : vector<6x32xf32> to vector<2x32xf32>
    %118 = vector.extract_strided_slice %5 {offsets = [2, 0], sizes = [2, 32], strides = [1, 1]} : vector<6x640xf32> to vector<2x32xf32>
    %119 = vector.extract_strided_slice %5 {offsets = [2, 128], sizes = [2, 32], strides = [1, 1]} : vector<6x640xf32> to vector<2x32xf32>
    %120 = vector.extract_strided_slice %5 {offsets = [2, 256], sizes = [2, 32], strides = [1, 1]} : vector<6x640xf32> to vector<2x32xf32>
    %121 = vector.extract_strided_slice %5 {offsets = [2, 384], sizes = [2, 16], strides = [1, 1]} : vector<6x640xf32> to vector<2x16xf32>
    %122 = vector.extract_strided_slice %5 {offsets = [2, 512], sizes = [2, 1], strides = [1, 1]} : vector<6x640xf32> to vector<2x1xf32>
    %123 = math.absf %122 : vector<2x1xf32>
    %cst_37 = arith.constant 0.000000e+00 : f32
    %124 = vector.broadcast %cst_37 : f32 to vector<2x1xf32>
    %125 = arith.subf %124, %123 : vector<2x1xf32>
    %126 = math.exp %125 : vector<2x1xf32>
    %127 = math.log1p %126 : vector<2x1xf32>
    %cst_38 = arith.constant 0.000000e+00 : f32
    %128 = vector.broadcast %cst_38 : f32 to vector<2x1xf32>
    %129 = arith.maximumf %122, %128 : vector<2x1xf32>
    %130 = arith.addf %127, %129 : vector<2x1xf32>
    %cst_39 = arith.constant 1.000000e+00 : f32
    %131 = vector.broadcast %cst_39 : f32 to vector<2x1xf32>
    %132 = arith.addf %130, %131 : vector<2x1xf32>
    %133 = vector.shape_cast %121 : vector<2x16xf32> to vector<2x1x16xf32>
    %134 = vector.broadcast %133 : vector<2x1x16xf32> to vector<2x8x16xf32>
    %135 = arith.mulf %110, %134 : vector<2x8x16xf32>
    %cst_40 = arith.constant dense<0.000000e+00> : vector<2x8xf32>
    %136 = vector.multi_reduction <add>, %135, %cst_40 [2] : vector<2x8x16xf32> to vector<2x8xf32>
    %137 = arith.mulf %110, %110 : vector<2x8x16xf32>
    %cst_41 = arith.constant dense<0.000000e+00> : vector<2x8xf32>
    %138 = vector.multi_reduction <add>, %137, %cst_41 [2] : vector<2x8x16xf32> to vector<2x8xf32>
    %139 = arith.mulf %121, %121 : vector<2x16xf32>
    %cst_42 = arith.constant dense<0.000000e+00> : vector<2xf32>
    %140 = vector.multi_reduction <add>, %139, %cst_42 [1] : vector<2x16xf32> to vector<2xf32>
    %141 = vector.shape_cast %140 : vector<2xf32> to vector<2x1xf32>
    %cst_43 = arith.constant 1.000000e-16 : f32
    %142 = vector.broadcast %cst_43 : f32 to vector<2x8xf32>
    %143 = arith.maximumf %138, %142 : vector<2x8xf32>
    %144 = math.rsqrt %143 : vector<2x8xf32>
    %145 = arith.mulf %136, %144 : vector<2x8xf32>
    %cst_44 = arith.constant 1.000000e-16 : f32
    %146 = vector.broadcast %cst_44 : f32 to vector<2x1xf32>
    %147 = arith.maximumf %141, %146 : vector<2x1xf32>
    %148 = math.rsqrt %147 : vector<2x1xf32>
    %149 = vector.broadcast %148 : vector<2x1xf32> to vector<2x8xf32>
    %150 = arith.mulf %145, %149 : vector<2x8xf32>
    %151 = vector.broadcast %132 : vector<2x1xf32> to vector<2x8xf32>
    %152 = arith.mulf %150, %151 : vector<2x8xf32>
    %cst_45 = arith.constant dense<0xFF800000> : vector<2xf32>
    %153 = vector.multi_reduction <maximumf>, %152, %cst_45 [1] : vector<2x8xf32> to vector<2xf32>
    %154 = vector.shape_cast %153 : vector<2xf32> to vector<2x1xf32>
    %155 = vector.broadcast %154 : vector<2x1xf32> to vector<2x8xf32>
    %156 = arith.subf %152, %155 : vector<2x8xf32>
    %157 = math.exp %156 : vector<2x8xf32>
    %cst_46 = arith.constant dense<0.000000e+00> : vector<2xf32>
    %158 = vector.multi_reduction <add>, %157, %cst_46 [1] : vector<2x8xf32> to vector<2xf32>
    %159 = vector.shape_cast %158 : vector<2xf32> to vector<2x1xf32>
    %160 = vector.broadcast %159 : vector<2x1xf32> to vector<2x8xf32>
    %161 = arith.divf %157, %160 : vector<2x8xf32>
    %162 = vector.shape_cast %161 : vector<2x8xf32> to vector<2x8x1xf32>
    %163 = vector.broadcast %162 : vector<2x8x1xf32> to vector<2x8x16xf32>
    %164 = arith.mulf %163, %110 : vector<2x8x16xf32>
    %cst_47 = arith.constant dense<0.000000e+00> : vector<2x16xf32>
    %165 = vector.multi_reduction <add>, %164, %cst_47 [1] : vector<2x8x16xf32> to vector<2x16xf32>
    %cst_48 = arith.constant dense<0.000000e+00> : vector<2x384xf32>
    %166 = tpu.matmul %165, %6, %cst_48 {dimension_numbers = #tpu.dot_dimension_numbers<[1], [0], [0], [1], [0, 0, 1, 1], [], []>} : vector<2x16xf32>, vector<16x384xf32>, vector<2x384xf32> -> vector<2x384xf32>
    %167 = vector.broadcast %7 : vector<1x384xf32> to vector<2x384xf32>
    %168 = arith.addf %166, %167 : vector<2x384xf32>
    %169 = vector.extract_strided_slice %168 {offsets = [0, 0], sizes = [2, 32], strides = [1, 1]} : vector<2x384xf32> to vector<2x32xf32>
    %170 = arith.addf %169, %118 : vector<2x32xf32>
    %171 = arith.negf %170 : vector<2x32xf32>
    %172 = math.exp %171 : vector<2x32xf32>
    %cst_49 = arith.constant 1.000000e+00 : f32
    %173 = vector.broadcast %cst_49 : f32 to vector<2x32xf32>
    %174 = arith.addf %173, %172 : vector<2x32xf32>
    %175 = arith.divf %173, %174 : vector<2x32xf32>
    %176 = vector.extract_strided_slice %168 {offsets = [0, 128], sizes = [2, 32], strides = [1, 1]} : vector<2x384xf32> to vector<2x32xf32>
    %177 = arith.addf %176, %119 : vector<2x32xf32>
    %178 = arith.negf %177 : vector<2x32xf32>
    %179 = math.exp %178 : vector<2x32xf32>
    %cst_50 = arith.constant 1.000000e+00 : f32
    %180 = vector.broadcast %cst_50 : f32 to vector<2x32xf32>
    %181 = arith.addf %180, %179 : vector<2x32xf32>
    %182 = arith.divf %180, %181 : vector<2x32xf32>
    %183 = vector.extract_strided_slice %168 {offsets = [0, 256], sizes = [2, 32], strides = [1, 1]} : vector<2x384xf32> to vector<2x32xf32>
    %184 = arith.mulf %175, %120 : vector<2x32xf32>
    %185 = arith.addf %183, %184 : vector<2x32xf32>
    %186 = math.tanh %185 : vector<2x32xf32>
    %cst_51 = arith.constant 1.000000e+00 : f32
    %187 = vector.broadcast %cst_51 : f32 to vector<2x32xf32>
    %188 = arith.subf %187, %182 : vector<2x32xf32>
    %189 = arith.mulf %188, %186 : vector<2x32xf32>
    %190 = arith.mulf %182, %117 : vector<2x32xf32>
    %191 = arith.addf %189, %190 : vector<2x32xf32>
    %cst_52 = arith.constant dense<0.000000e+00> : vector<2x384xf32>
    %192 = tpu.matmul %191, %8, %cst_52 {dimension_numbers = #tpu.dot_dimension_numbers<[1], [0], [0], [1], [0, 0, 1, 1], [], []>} : vector<2x32xf32>, vector<32x384xf32>, vector<2x384xf32> -> vector<2x384xf32>
    %193 = vector.broadcast %9 : vector<1x384xf32> to vector<2x384xf32>
    %194 = arith.addf %192, %193 : vector<2x384xf32>
    %195 = vector.extract_strided_slice %194 {offsets = [0, 0], sizes = [2, 16], strides = [1, 1]} : vector<2x384xf32> to vector<2x16xf32>
    %196 = arith.negf %195 : vector<2x16xf32>
    %197 = math.exp %196 : vector<2x16xf32>
    %cst_53 = arith.constant 1.000000e+00 : f32
    %198 = vector.broadcast %cst_53 : f32 to vector<2x16xf32>
    %199 = arith.addf %198, %197 : vector<2x16xf32>
    %200 = arith.divf %198, %199 : vector<2x16xf32>
    %201 = vector.extract_strided_slice %194 {offsets = [0, 128], sizes = [2, 16], strides = [1, 1]} : vector<2x384xf32> to vector<2x16xf32>
    %202 = vector.extract_strided_slice %194 {offsets = [0, 256], sizes = [2, 32], strides = [1, 1]} : vector<2x384xf32> to vector<2x32xf32>
    %203 = vector.shape_cast %161 : vector<2x8xf32> to vector<2x8x1xf32>
    %204 = vector.shape_cast %200 : vector<2x16xf32> to vector<2x1x16xf32>
    %205 = vector.broadcast %203 : vector<2x8x1xf32> to vector<2x8x16xf32>
    %206 = vector.broadcast %204 : vector<2x1x16xf32> to vector<2x8x16xf32>
    %207 = arith.mulf %205, %206 : vector<2x8x16xf32>
    %208 = vector.shape_cast %161 : vector<2x8xf32> to vector<2x8x1xf32>
    %209 = vector.shape_cast %201 : vector<2x16xf32> to vector<2x1x16xf32>
    %210 = vector.broadcast %208 : vector<2x8x1xf32> to vector<2x8x16xf32>
    %211 = vector.broadcast %209 : vector<2x1x16xf32> to vector<2x8x16xf32>
    %212 = arith.mulf %210, %211 : vector<2x8x16xf32>
    %cst_54 = arith.constant 1.000000e+00 : f32
    %213 = vector.broadcast %cst_54 : f32 to vector<2x8x16xf32>
    %214 = arith.subf %213, %207 : vector<2x8x16xf32>
    %215 = arith.mulf %110, %214 : vector<2x8x16xf32>
    %216 = arith.addf %215, %212 : vector<2x8x16xf32>
    %c0_55 = arith.constant 0 : index
    %c1 = arith.constant 1 : index
    %c0_56 = arith.constant 0 : index
    %217 = vector.load %arg4[%c0_55, %c1, %c0_56] : memref<2x3x64xf32, #tpu.memory_space<vmem>>, vector<2x1x32xf32>
    %218 = vector.shape_cast %217 : vector<2x1x32xf32> to vector<2x32xf32>
    %219 = vector.shape_cast %191 : vector<2x32xf32> to vector<2x1x32xf32>
    tpu.vector_store %arg4[%c0_55, %c1, %c0_56], %219 {strides = array<i32>} : memref<2x3x64xf32, #tpu.memory_space<vmem>>, vector<2x1x32xf32>,
    %c0_57 = arith.constant 0 : index
    %c1_58 = arith.constant 1 : index
    %c32_59 = arith.constant 32 : index
    %220 = vector.load %arg4[%c0_57, %c1_58, %c32_59] : memref<2x3x64xf32, #tpu.memory_space<vmem>>, vector<2x1x32xf32>
    %221 = vector.shape_cast %220 : vector<2x1x32xf32> to vector<2x32xf32>
    %222 = vector.shape_cast %202 : vector<2x32xf32> to vector<2x1x32xf32>
    tpu.vector_store %arg4[%c0_57, %c1_58, %c32_59], %222 {strides = array<i32>} : memref<2x3x64xf32, #tpu.memory_space<vmem>>, vector<2x1x32xf32>,
    %223 = vector.extract_strided_slice %0 {offsets = [4, 0], sizes = [2, 32], strides = [1, 1]} : vector<6x32xf32> to vector<2x32xf32>
    %224 = vector.extract_strided_slice %5 {offsets = [4, 0], sizes = [2, 32], strides = [1, 1]} : vector<6x640xf32> to vector<2x32xf32>
    %225 = vector.extract_strided_slice %5 {offsets = [4, 128], sizes = [2, 32], strides = [1, 1]} : vector<6x640xf32> to vector<2x32xf32>
    %226 = vector.extract_strided_slice %5 {offsets = [4, 256], sizes = [2, 32], strides = [1, 1]} : vector<6x640xf32> to vector<2x32xf32>
    %227 = vector.extract_strided_slice %5 {offsets = [4, 384], sizes = [2, 16], strides = [1, 1]} : vector<6x640xf32> to vector<2x16xf32>
    %228 = vector.extract_strided_slice %5 {offsets = [4, 512], sizes = [2, 1], strides = [1, 1]} : vector<6x640xf32> to vector<2x1xf32>
    %229 = math.absf %228 : vector<2x1xf32>
    %cst_60 = arith.constant 0.000000e+00 : f32
    %230 = vector.broadcast %cst_60 : f32 to vector<2x1xf32>
    %231 = arith.subf %230, %229 : vector<2x1xf32>
    %232 = math.exp %231 : vector<2x1xf32>
    %233 = math.log1p %232 : vector<2x1xf32>
    %cst_61 = arith.constant 0.000000e+00 : f32
    %234 = vector.broadcast %cst_61 : f32 to vector<2x1xf32>
    %235 = arith.maximumf %228, %234 : vector<2x1xf32>
    %236 = arith.addf %233, %235 : vector<2x1xf32>
    %cst_62 = arith.constant 1.000000e+00 : f32
    %237 = vector.broadcast %cst_62 : f32 to vector<2x1xf32>
    %238 = arith.addf %236, %237 : vector<2x1xf32>
    %239 = vector.shape_cast %227 : vector<2x16xf32> to vector<2x1x16xf32>
    %240 = vector.broadcast %239 : vector<2x1x16xf32> to vector<2x8x16xf32>
    %241 = arith.mulf %216, %240 : vector<2x8x16xf32>
    %cst_63 = arith.constant dense<0.000000e+00> : vector<2x8xf32>
    %242 = vector.multi_reduction <add>, %241, %cst_63 [2] : vector<2x8x16xf32> to vector<2x8xf32>
    %243 = arith.mulf %216, %216 : vector<2x8x16xf32>
    %cst_64 = arith.constant dense<0.000000e+00> : vector<2x8xf32>
    %244 = vector.multi_reduction <add>, %243, %cst_64 [2] : vector<2x8x16xf32> to vector<2x8xf32>
    %245 = arith.mulf %227, %227 : vector<2x16xf32>
    %cst_65 = arith.constant dense<0.000000e+00> : vector<2xf32>
    %246 = vector.multi_reduction <add>, %245, %cst_65 [1] : vector<2x16xf32> to vector<2xf32>
    %247 = vector.shape_cast %246 : vector<2xf32> to vector<2x1xf32>
    %cst_66 = arith.constant 1.000000e-16 : f32
    %248 = vector.broadcast %cst_66 : f32 to vector<2x8xf32>
    %249 = arith.maximumf %244, %248 : vector<2x8xf32>
    %250 = math.rsqrt %249 : vector<2x8xf32>
    %251 = arith.mulf %242, %250 : vector<2x8xf32>
    %cst_67 = arith.constant 1.000000e-16 : f32
    %252 = vector.broadcast %cst_67 : f32 to vector<2x1xf32>
    %253 = arith.maximumf %247, %252 : vector<2x1xf32>
    %254 = math.rsqrt %253 : vector<2x1xf32>
    %255 = vector.broadcast %254 : vector<2x1xf32> to vector<2x8xf32>
    %256 = arith.mulf %251, %255 : vector<2x8xf32>
    %257 = vector.broadcast %238 : vector<2x1xf32> to vector<2x8xf32>
    %258 = arith.mulf %256, %257 : vector<2x8xf32>
    %cst_68 = arith.constant dense<0xFF800000> : vector<2xf32>
    %259 = vector.multi_reduction <maximumf>, %258, %cst_68 [1] : vector<2x8xf32> to vector<2xf32>
    %260 = vector.shape_cast %259 : vector<2xf32> to vector<2x1xf32>
    %261 = vector.broadcast %260 : vector<2x1xf32> to vector<2x8xf32>
    %262 = arith.subf %258, %261 : vector<2x8xf32>
    %263 = math.exp %262 : vector<2x8xf32>
    %cst_69 = arith.constant dense<0.000000e+00> : vector<2xf32>
    %264 = vector.multi_reduction <add>, %263, %cst_69 [1] : vector<2x8xf32> to vector<2xf32>
    %265 = vector.shape_cast %264 : vector<2xf32> to vector<2x1xf32>
    %266 = vector.broadcast %265 : vector<2x1xf32> to vector<2x8xf32>
    %267 = arith.divf %263, %266 : vector<2x8xf32>
    %268 = vector.shape_cast %267 : vector<2x8xf32> to vector<2x8x1xf32>
    %269 = vector.broadcast %268 : vector<2x8x1xf32> to vector<2x8x16xf32>
    %270 = arith.mulf %269, %216 : vector<2x8x16xf32>
    %cst_70 = arith.constant dense<0.000000e+00> : vector<2x16xf32>
    %271 = vector.multi_reduction <add>, %270, %cst_70 [1] : vector<2x8x16xf32> to vector<2x16xf32>
    %cst_71 = arith.constant dense<0.000000e+00> : vector<2x384xf32>
    %272 = tpu.matmul %271, %6, %cst_71 {dimension_numbers = #tpu.dot_dimension_numbers<[1], [0], [0], [1], [0, 0, 1, 1], [], []>} : vector<2x16xf32>, vector<16x384xf32>, vector<2x384xf32> -> vector<2x384xf32>
    %273 = vector.broadcast %7 : vector<1x384xf32> to vector<2x384xf32>
    %274 = arith.addf %272, %273 : vector<2x384xf32>
    %275 = vector.extract_strided_slice %274 {offsets = [0, 0], sizes = [2, 32], strides = [1, 1]} : vector<2x384xf32> to vector<2x32xf32>
    %276 = arith.addf %275, %224 : vector<2x32xf32>
    %277 = arith.negf %276 : vector<2x32xf32>
    %278 = math.exp %277 : vector<2x32xf32>
    %cst_72 = arith.constant 1.000000e+00 : f32
    %279 = vector.broadcast %cst_72 : f32 to vector<2x32xf32>
    %280 = arith.addf %279, %278 : vector<2x32xf32>
    %281 = arith.divf %279, %280 : vector<2x32xf32>
    %282 = vector.extract_strided_slice %274 {offsets = [0, 128], sizes = [2, 32], strides = [1, 1]} : vector<2x384xf32> to vector<2x32xf32>
    %283 = arith.addf %282, %225 : vector<2x32xf32>
    %284 = arith.negf %283 : vector<2x32xf32>
    %285 = math.exp %284 : vector<2x32xf32>
    %cst_73 = arith.constant 1.000000e+00 : f32
    %286 = vector.broadcast %cst_73 : f32 to vector<2x32xf32>
    %287 = arith.addf %286, %285 : vector<2x32xf32>
    %288 = arith.divf %286, %287 : vector<2x32xf32>
    %289 = vector.extract_strided_slice %274 {offsets = [0, 256], sizes = [2, 32], strides = [1, 1]} : vector<2x384xf32> to vector<2x32xf32>
    %290 = arith.mulf %281, %226 : vector<2x32xf32>
    %291 = arith.addf %289, %290 : vector<2x32xf32>
    %292 = math.tanh %291 : vector<2x32xf32>
    %cst_74 = arith.constant 1.000000e+00 : f32
    %293 = vector.broadcast %cst_74 : f32 to vector<2x32xf32>
    %294 = arith.subf %293, %288 : vector<2x32xf32>
    %295 = arith.mulf %294, %292 : vector<2x32xf32>
    %296 = arith.mulf %288, %223 : vector<2x32xf32>
    %297 = arith.addf %295, %296 : vector<2x32xf32>
    %cst_75 = arith.constant dense<0.000000e+00> : vector<2x384xf32>
    %298 = tpu.matmul %297, %8, %cst_75 {dimension_numbers = #tpu.dot_dimension_numbers<[1], [0], [0], [1], [0, 0, 1, 1], [], []>} : vector<2x32xf32>, vector<32x384xf32>, vector<2x384xf32> -> vector<2x384xf32>
    %299 = vector.broadcast %9 : vector<1x384xf32> to vector<2x384xf32>
    %300 = arith.addf %298, %299 : vector<2x384xf32>
    %301 = vector.extract_strided_slice %300 {offsets = [0, 256], sizes = [2, 32], strides = [1, 1]} : vector<2x384xf32> to vector<2x32xf32>
    %c0_76 = arith.constant 0 : index
    %c2 = arith.constant 2 : index
    %c0_77 = arith.constant 0 : index
    %302 = vector.load %arg4[%c0_76, %c2, %c0_77] : memref<2x3x64xf32, #tpu.memory_space<vmem>>, vector<2x1x32xf32>
    %303 = vector.shape_cast %302 : vector<2x1x32xf32> to vector<2x32xf32>
    %304 = vector.shape_cast %297 : vector<2x32xf32> to vector<2x1x32xf32>
    tpu.vector_store %arg4[%c0_76, %c2, %c0_77], %304 {strides = array<i32>} : memref<2x3x64xf32, #tpu.memory_space<vmem>>, vector<2x1x32xf32>,
    %c0_78 = arith.constant 0 : index
    %c2_79 = arith.constant 2 : index
    %c32_80 = arith.constant 32 : index
    %305 = vector.load %arg4[%c0_78, %c2_79, %c32_80] : memref<2x3x64xf32, #tpu.memory_space<vmem>>, vector<2x1x32xf32>
    %306 = vector.shape_cast %305 : vector<2x1x32xf32> to vector<2x32xf32>
    %307 = vector.shape_cast %301 : vector<2x32xf32> to vector<2x1x32xf32>
    tpu.vector_store %arg4[%c0_78, %c2_79, %c32_80], %307 {strides = array<i32>} : memref<2x3x64xf32, #tpu.memory_space<vmem>>, vector<2x1x32xf32>,
    return
  }
}

</mosaic_0001>

<bundles_post_ra>
// kernel: ntm_forward.1
= control target key start
LH: loop header
LB: loop body
LE: loop exit
PB: predicated region body
PF: predicated region fallthrough
CT: control target
= control target key end

     0   :  { %9 = vsyncpa [#allocation3], 0  ;;  %s1978_s0 = inlined_call_operand.vmem [shape: f32[6,32], index: 0, kind: input, shape index: {}]   ;;  %s1979_s1 = inlined_call_operand.vmem [shape: f32[2,8,16], index: 1, kind: input, shape index: {}]   ;;  %s1980_s2 = inlined_call_operand.hbm [shape: f32[32,1408], index: 2, kind: input, shape index: {}]   ;;  %s1981_s3 = inlined_call_operand.hbm [shape: f32[1,1408], index: 3, kind: input, shape index: {}]   ;;  %s1982_s4 = inlined_call_operand.vmem [shape: f32[2,3,64], index: 4, kind: output, shape index: {}]  }
   0x1   :  { %s19_s17 = sshll.u32 %s1980_s2, 4  ;;  %s20_s17 = int_to_ptr.hbm [resolvable:$true] %s19_s17 }
   0x2   :  { %10 = vsyncpa [#allocation5], 0  ;;  %s1597_s18 = smov [#allocation2]   ;;  %s33_s22 = sshll.u32 %s1981_s3, 4  ;;  %s34_s22 = int_to_ptr.hbm [resolvable:$true] %s33_s22 }
   0x3   :  { %s21_s19 = sshll.u32 %s1597_s18, 4  ;;  %s1598_s23 = smov 1408   ;;  %s22_s19 = int_to_ptr.vmem [resolvable:$true] %s21_s19 }
   0x4   :  { %s1599_s24 = smov 88   ;;  %s1600_s25 = smov [#allocation4]  }
   0x5   :  { %27 = dma.hbm_to_vmem [thread:$0]  %s20_s17, 5632, %s22_s19, [#allocation3], %s1598_s23, %s1598_s23, %s1599_s24  }
   0x6   :  { %s35_s26 = sshll.u32 %s1600_s25, 4  ;;  %s36_s26 = int_to_ptr.vmem [resolvable:$true] %s35_s26 }
   0x7   :  { %38 = dma.hbm_to_vmem [thread:$0]  %s34_s22, 176, %s36_s26, [#allocation5]  }
   0x8   :  { %1593 = dma.done.wait [#allocation3], 5632  }
   0x9   :  { %1594 = vsyncadd [#allocation3], 4294961664 }
   0xa   :  { %1595 = dma.done.wait [#allocation5], 176  }
   0xb   :  { %1596 = vsyncadd [#allocation5], 4294967120  ;;  %v63_v0 = vld [vmem:[#allocation2 + $0x108] sm:$0xff]  ;;  %v66_v1 = vld [vmem:[#allocation2 + $0x120] sm:$0xff]  ;;  %vm230_vm0 = vcmask 130048   ;;  %vm80_vm1 = vcmask 261120  }
   0xc   :  { %v58_v2 = vld [vmem:[#allocation2 + $0xb0] sm:$0xff]  ;;  %96 = vmatpush.msra.mxu0 %v63_v0  ;;  %156 = vmatpush.msra.mxu3 %v66_v1  ;;  %v61_v3 = vld [vmem:[#allocation2 + $0xc8] sm:$0xff]  ;;  %v53_v4 = vld [vmem:[#allocation2 + $0x58] sm:$0xff]  ;;  %v1601_v19 = vmov 0   ;;  %vm246_vm2 = vcmask 123904   ;;  %vm314_vm13 = vcmask 1041409  }
   0xd   :  { %v56_v5 = vld [vmem:[#allocation2 + $0x70] sm:$0xff]  ;;  %v48_v6 = vld [vmem:[#allocation2] sm:$0xff]  ;;  %v51_v7 = vld [vmem:[#allocation2 + $0x18] sm:$0xff]  ;;  %1457 = vset.pattern.permute.xlu2 %v1601_v19  ;;  %1459 = vset.pattern.permute.xlu1 %v1601_v19  ;;  %vm317_vm14 = vcmask 58368   ;;  %s1602_s13 = smov 32  }
   0xe   :  { %97 = vmatpush.msra.mxu0 %v58_v2  ;;  %157 = vmatpush.msra.mxu3 %v61_v3  ;;  %v1637_v8 = vld [vmem:[%s1979_s1] sm:$0xff]  ;;  %v67_v11 = vld [vmem:[#allocation2 + $0x128] sm:$0xff]  ;;  %v1650_v13 = vld [vmem:[%s1979_s1 + $0x8] sm:$0xff] }
   0xf   :  { %v1642_v9 = vld [vmem:[%s1978_s0] sm:$0x3f]  ;;  %v237_v10 = vmul.f32 %v1637_v8, %v1637_v8  ;;  %v62_v14 = vld [vmem:[#allocation2 + $0xd0] sm:$0xff]  ;;  %v238_v16 = vmul.f32 %v1650_v13, %v1650_v13  ;;  %v52_v17 = vld [vmem:[#allocation2 + $0x20] sm:$0xff]  ;;  %1458 = vset.pattern.permute.xlu0 %v1601_v19 }
  0x10   :  { %98 = vmatpush.msra.mxu0 %v53_v4  ;;  %158 = vmatpush.msra.mxu3 %v56_v5  ;;  %v57_v15 = vld [vmem:[#allocation2 + $0x78] sm:$0xff]  ;;  %v1661_v20 = vld [vmem:[#allocation4] sm:$0x1f] }
  0x11   :  { %v239_v12 = vsel %vm230_vm0, %v237_v10, 0.0  ;;  %v242_v18 = vsel %vm230_vm0, %v238_v16, 0.0  ;;  %v73_v22 = vperm.slane %v1661_v20, 3  ;;  %v74_v23 = vperm.slane %v1661_v20, 4 }
  0x12   :  { %99 = vmatpush.msra.mxu0 %v48_v6  ;;  %159 = vmatpush.msra.mxu3 %v51_v7 }
  0x13   :  { %1422 = vmatmul.msk.f32.vlgmr.msra.gmra.mxu0 %vm80_vm1, %v1642_v9  ;;  %1425 = vmatmul.msk.f32.vlgmr.msra.gmra.mxu3 %vm80_vm1, %v1642_v9 }
  0x14   :  { %176 = vmatpush.msrb.mxu0 %v67_v11  ;;  %240 = vadd.xlane.f32.xlu0 %v239_v12 }
  0x16   :  { %177 = vmatpush.msrb.mxu0 %v62_v14 }
  0x18   :  { %178 = vmatpush.msrb.mxu0 %v57_v15 }
  0x1a   :  { %179 = vmatpush.msrb.mxu0 %v52_v17 }
  0x1b   :  { %1426 = vmatmul.msk.f32.vlgmr.msrb.gmra.mxu0 %vm80_vm1, %v1642_v9 }
  0x1c   :  { %243 = vadd.xlane.f32.xlu0 %v242_v18 }
  0x87   :  { %v241_v54 = vpop.xlane.xlu0 %240 }
  0x88   :  { %v250_v57 = vmax.f32 %v241_v54, 1e-16 }
  0x8a   :  { %vm258_vm6 = vweird.f32 %v250_v57 }
  0x8f   :  { %v244_v55 = vpop.xlane.xlu0 %243 }
  0x90   :  { %v1663_v21 = vpop.f32.mrf.mxu0  ;;  %v251_v56 = vmax.f32 %v244_v55, 1e-16 }
  0x92   :  { %vm268_vm4 = vweird.f32 %v251_v56 }
  0x96   :  { %v161_v24 = vpop.f32.mrf.mxu3 }
  0x97   :  { %v162_v25 = vadd.f32 %v161_v24, %v73_v22 }
  0x98   :  { %v181_v26 = vpop.f32.mrf.mxu0 }
  0x99   :  { %656 = vst [vmem:[#allocation1] sm:$0xff] %v162_v25  ;;  %v182_v27 = vadd.f32 %v181_v26, %v74_v23  ;;  %v1667_v28 = vmul.f32 %v162_v25, %v162_v25  ;;  %v223_v29 = vrot.slane %v162_v25, 1  ;;  %v224_v33 = vperm.slane %v162_v25, 0 }
  0x9b   :  { %v206_v30 = vand.u32 2147483647, %v182_v27  ;;  %v247_v31 = vsel %vm246_vm2, %v1667_v28, 0.0  ;;  %v225_v32 = vperm.slane %v223_v29, 0  ;;  %v228_v38 = vmul.f32 %v224_v33, %v1637_v8 }
  0x9c   :  { %248 = vadd.xlane.f32.xlu1 %v247_v31  ;;  %v219_v50 = vmax.f32 %v182_v27, 0.0 }
  0x9d   :  { %v207_v34 = vsub.f32 0.0, %v206_v30  ;;  %v229_v35 = vmul.f32 %v225_v32, %v1650_v13  ;;  %v231_v41 = vsel %vm230_vm0, %v228_v38, 0.0 }
  0x9f   :  { %v208_v36 = vmul.f32 1.442695, %v207_v34  ;;  %v234_v37 = vsel %vm230_vm0, %v229_v35, 0.0 }
  0xa0   :  { %235 = vadd.xlane.f32.xlu2 %v234_v37  ;;  %v1673_v39 = vld [vmem:[#allocation1 + $0x2] ss:$9 sm:$0xff] }
  0xa1   :  { %v1675_v40 = vld [vmem:[#allocation1 + $0x3] ss:$9 sm:$0xff]  ;;  %1460 = vpow2.f32 %v208_v36  ;;  %v310_v36 = vlaneseq }
  0xa2   :  { %1078 = vst [vmem:[#allocation1] sm:$0xff] %v162_v25 }
  0xa3   :  { %v1682_v37 = vand.u32 127, %v310_v36  ;;  %v50_v36 = vld [vmem:[#allocation2 + $0x10] sm:$0xff] }
  0xa4   :  { %232 = vadd.xlane.f32.xlu1 %v231_v41 }
  0xa7   :  { %v1461_v42 = vpop.eup %1460 }
  0xa8   :  { %v210_v43 = vadd.f32 1.0, %v1461_v42  ;;  %v213_v44 = vmul.f32 -0.5, %v1461_v42  ;;  %v216_v46 = vand.u32 2147483647, %v1461_v42 }
  0xaa   :  { %1462 = vlog2.f32 %v210_v43  ;;  %v214_v45 = vadd.f32 1.0, %v213_v44  ;;  %vm217_vm3 = vcmp.lt.f32.partialorder %v216_v46, 0.0004427343 }
  0xab   :  { %1464 = vrsqrt.f32 %v251_v56 }
  0xac   :  { %v215_v47 = vmul.f32 %v1461_v42, %v214_v45  ;;  %1466 = vrsqrt.f32 %v250_v57 }
  0xb0   :  { %v1463_v48 = vpop.eup %1462 }
  0xb1   :  { %v212_v49 = vmul.f32 0.6931472, %v1463_v48  ;;  %v1465_v58 = vpop.eup %1464 }
  0xb2   :  { %v1467_v59 = vpop.eup %1466  ;;  %v263_v60 = vmul.f32 %v1465_v58, %v251_v56  ;;  %vm269_vm5 = vweird.f32 %v1465_v58 }
  0xb3   :  { %v218_v51 = vsel %vm217_vm3, %v215_v47, %v212_v49  ;;  %v253_v61 = vmul.f32 %v1467_v59, %v250_v57  ;;  %vm259_vm7 = vweird.f32 %v1467_v59  ;;  %vm270_vm8 = vmor %vm268_vm4, %vm269_vm5 }
  0xb4   :  { %v220_v52 = vadd.f32 %v219_v50, %v218_v51  ;;  %v264_v0 = vmul.f32 %v1465_v58, %v263_v60  ;;  %vm260_vm10 = vmor %vm258_vm6, %vm259_vm7 }
  0xb5   :  { %v254_v1 = vmul.f32 %v1467_v59, %v253_v61 }
  0xb6   :  { %v221_v53 = vadd.f32 1.0, %v220_v52  ;;  %v265_v2 = vmul.f32 0.5, %v264_v0 }
  0xb7   :  { %v255_v3 = vmul.f32 0.5, %v254_v1 }
  0xb8   :  { %294 = vperm.xlu2 %1457, %v221_v53   ;;  %v266_v6 = vsub.f32 1.5, %v265_v2 }
  0xb9   :  { %v256_v11 = vsub.f32 1.5, %v255_v3 }
  0xba   :  { %v267_v14 = vmul.f32 %v1465_v58, %v266_v6 }
  0xbb   :  { %v257_v16 = vmul.f32 %v1467_v59, %v256_v11 }
  0xbc   :  { %v271_v17 = vsel %vm270_vm8, %v1465_v58, %v267_v14 }
  0xbd   :  { %v261_v23 = vsel %vm260_vm10, %v1467_v59, %v257_v16 }
 0x10f   :  { %v249_v62 = vpop.xlane.xlu1 %248 }
 0x110   :  { %v274_v63 = vmax.f32 %v249_v62, 1e-16 }
 0x112   :  { %1468 = vrsqrt.f32 %v274_v63  ;;  %vm281_vm11 = vweird.f32 %v274_v63 }
 0x113   :  { %v236_v7 = vpop.xlane.xlu2 %235 }
 0x114   :  { %v273_v26 = vmul.f32 %v271_v17, %v236_v7 }
 0x117   :  { %v233_v19 = vpop.xlane.xlu1 %232 }
 0x118   :  { %v1469_v4 = vpop.eup %1468  ;;  %v272_v29 = vmul.f32 %v261_v23, %v233_v19 }
 0x119   :  { %v276_v5 = vmul.f32 %v1469_v4, %v274_v63  ;;  %vm282_vm9 = vweird.f32 %v1469_v4 }
 0x11a   :  { %vm283_vm12 = vmor %vm281_vm11, %vm282_vm9 }
 0x11b   :  { %v277_v10 = vmul.f32 %v1469_v4, %v276_v5  ;;  %v1678_v24 = vpop.permute.xlu2 %294 }
 0x11c   :  { %v297_v32 = vperm.slane %v1678_v24, 1  ;;  %v296_v33 = vperm.slane %v1678_v24, 0 }
 0x11d   :  { %v278_v12 = vmul.f32 0.5, %v277_v10 }
 0x11f   :  { %v279_v15 = vsub.f32 1.5, %v278_v12 }
 0x121   :  { %v280_v18 = vmul.f32 %v1469_v4, %v279_v15 }
 0x123   :  { %v284_v22 = vsel %vm283_vm12, %v1469_v4, %v280_v18 }
 0x124   :  { %v287_v25 = vperm.slane %v284_v22, 1  ;;  %v286_v27 = vperm.slane %v284_v22, 0 }
 0x126   :  { %v291_v30 = vmul.f32 %v287_v25, %v273_v26  ;;  %v290_v31 = vmul.f32 %v286_v27, %v272_v29  ;;  %v64_v29 = vld [vmem:[#allocation2 + $0x110] sm:$0xff] }
 0x127   :  { %116 = vmatpush.msra.mxu1 %v64_v29  ;;  %v1754_v29 = vld [vmem:[#allocation2 + $0x100] sm:$0xff] }
 0x128   :  { %v301_v34 = vmul.f32 %v297_v32, %v291_v30  ;;  %v300_v35 = vmul.f32 %v296_v33, %v290_v31  ;;  %v65_v30 = vld [vmem:[#allocation2 + $0x118] sm:$0xff]  ;;  %v60_v32 = vld [vmem:[#allocation2 + $0xc0] sm:$0xff] }
 0x129   :  { %136 = vmatpush.msra.mxu2 %v65_v30  ;;  %v59_v31 = vld [vmem:[#allocation2 + $0xb8] sm:$0xff]  ;;  %v54_v33 = vld [vmem:[#allocation2 + $0x60] sm:$0xff] }
 0x12a   :  { %308 = vperm.xlu1 %1459, %v301_v34   ;;  %305 = vperm.xlu0 %1458, %v300_v35   ;;  %v194_v30 = vld [vmem:[#allocation2 + $0x98] sm:$0xff] }
 0x12b   :  { %117 = vmatpush.msra.mxu1 %v59_v31  ;;  %137 = vmatpush.msra.mxu2 %v60_v32  ;;  %v195_v31 = vld [vmem:[#allocation2 + $0xa0] sm:$0xff]  ;;  %v1756_v32 = vld [vmem:[#allocation2 + $0xa8] sm:$0xff] }
 0x12d   :  { %118 = vmatpush.msra.mxu1 %v54_v33 }
 0x19c   :  { %v309_v38 = vpop.permute.xlu1 %308  ;;  %v306_v41 = vpop.permute.xlu0 %305 }
 0x19d   :  { %v313_v42 = vperm.slane %v309_v38, %v1682_v37  ;;  %v312_v43 = vperm.slane %v306_v41, %v1682_v37  ;;  %v1696_v38 = vld [vmem:[#allocation2 + $0x80] sm:$0xff]  ;;  %v1698_v41 = vld [vmem:[#allocation2 + $0x88] sm:$0xff] }
 0x19f   :  { %v315_v44 = vsel %vm314_vm13, %v313_v42, %v312_v43  ;;  %v1700_v42 = vld [vmem:[#allocation2 + $0x28] sm:$0xff]  ;;  %v1704_v43 = vld [vmem:[#allocation2 + $0x90] sm:$0xff] }
 0x1a0   :  { %v318_v45 = vsel %vm317_vm14, %v315_v44, -inf  ;;  %v1706_v44 = vld [vmem:[#allocation2 + $0x30] sm:$0xff]  ;;  %474 = vmatpush.msrb.mxu3 %v1704_v43 }
 0x1a1   :  { %319 = vmax.xlane.f32.xlu2 %v318_v45  ;;  %v1708_v45 = vld [vmem:[#allocation2 + $0x38] sm:$0xff] }
 0x1a2   :  { %475 = vmatpush.msrb.mxu3 %v1708_v45 }
 0x1a4   :  { %854 = vmatpush.msra.mxu3 %v1696_v38 }
 0x1a6   :  { %855 = vmatpush.msra.mxu3 %v1700_v42 }
 0x214   :  { %v320_v46 = vpop.xlane.xlu2 %319 }
 0x215   :  { %v322_v47 = vperm.slane %v320_v46, 0  ;;  %v323_v48 = vperm.slane %v320_v46, 1 }
 0x217   :  { %v326_v49 = vsub.f32 %v300_v35, %v322_v47  ;;  %v327_v51 = vsub.f32 %v301_v34, %v323_v48  ;;  %v55_v34 = vld [vmem:[#allocation2 + $0x68] sm:$0xff] }
 0x218   :  { %138 = vmatpush.msra.mxu2 %v55_v34  ;;  %v49_v35 = vld [vmem:[#allocation2 + $0x8] sm:$0xff]  ;;  %v191_v34 = vld [vmem:[#allocation2 + $0x40] sm:$0xff] }
 0x219   :  { %v328_v50 = vmul.f32 1.442695, %v326_v49  ;;  %v330_v52 = vmul.f32 1.442695, %v327_v51  ;;  %119 = vmatpush.msra.mxu1 %v49_v35  ;;  %v192_v35 = vld [vmem:[#allocation2 + $0x48] sm:$0xff] }
 0x21a   :  { %139 = vmatpush.msra.mxu2 %v50_v36  ;;  %1423 = vmatmul.msk.f32.vlgmr.msra.gmra.mxu1 %vm80_vm1, %v1642_v9 }
 0x21b   :  { %1470 = vpow2.f32 %v328_v50  ;;  %1424 = vmatmul.msk.f32.vlgmr.msra.gmra.mxu2 %vm80_vm1, %v1642_v9  ;;  %434 = vmatpush.msrb.mxu1 %v1696_v38 }
 0x21c   :  { %1472 = vpow2.f32 %v330_v52  ;;  %454 = vmatpush.msrb.mxu2 %v1698_v41 }
 0x21d   :  { %435 = vmatpush.msrb.mxu1 %v1700_v42 }
 0x21e   :  { %455 = vmatpush.msrb.mxu2 %v1706_v44 }
 0x221   :  { %v1471_v53 = vpop.eup %1470 }
 0x222   :  { %335 = vperm.xlu1 %1459, %v1471_v53   ;;  %v1473_v54 = vpop.eup %1472 }
 0x22a   :  { %338 = vperm.xlu1 %1459, %v1473_v54  }
 0x294   :  { %v336_v55 = vpop.permute.xlu1 %335 }
 0x295   :  { %v340_v57 = vperm.slane %v336_v55, %v1682_v37 }
 0x29c   :  { %v339_v56 = vpop.permute.xlu1 %338 }
 0x29d   :  { %v341_v58 = vperm.slane %v339_v56, %v1682_v37 }
 0x29f   :  { %v342_v59 = vsel %vm314_vm13, %v341_v58, %v340_v57 }
 0x2a0   :  { %v344_v60 = vsel %vm317_vm14, %v342_v59, 0.0 }
 0x2a1   :  { %345 = vadd.xlane.f32.xlu0 %v344_v60 }
 0x314   :  { %v346_v61 = vpop.xlane.xlu0 %345 }
 0x315   :  { %v348_v62 = vperm.slane %v346_v61, 0  ;;  %v349_v63 = vperm.slane %v346_v61, 1 }
 0x317   :  { %1474 = vrcp.f32 %v348_v62  ;;  %v363_v6 = vand.u32 2147483648, %v348_v62  ;;  %v361_v10 = vand.u32 2147483647, %v348_v62  ;;  %vm357_vm2 = vweird.f32 %v348_v62 }
 0x318   :  { %1476 = vrcp.f32 %v349_v63  ;;  %v378_v18 = vand.u32 2147483648, %v349_v63  ;;  %vm372_vm6 = vweird.f32 %v349_v63  ;;  %v376_v22 = vand.u32 2147483647, %v349_v63 }
 0x319   :  { %v364_v14 = vor.u32 1.1754944e-38, %v363_v6  ;;  %vm362_vm4 = vcmp.eq.f32.partialorder %v361_v10, 8.507059e+37 }
 0x31a   :  { %v379_v25 = vor.u32 1.1754944e-38, %v378_v18  ;;  %vm377_vm8 = vcmp.eq.f32.partialorder %v376_v22, 8.507059e+37  ;;  %v201_v22 = vld [vmem:[#allocation2 + $0x150] sm:$0xff] }
 0x31b   :  { %569 = vmatpush.msra.mxu1 %v201_v22 }
 0x31d   :  { %v1475_v0 = vpop.eup %1474 }
 0x31e   :  { %v1477_v1 = vpop.eup %1476  ;;  %v353_v2 = vmul.f32 %v1475_v0, %v348_v62  ;;  %vm358_vm15 = vweird.f32 %v1475_v0 }
 0x31f   :  { %v368_v3 = vmul.f32 %v1477_v1, %v349_v63  ;;  %vm359_vm3 = vmor %vm357_vm2, %vm358_vm15  ;;  %vm373_vm5 = vweird.f32 %v1477_v1 }
 0x320   :  { %v354_v4 = vsub.f32 1.0, %v353_v2  ;;  %vm374_vm7 = vmor %vm372_vm6, %vm373_vm5  ;;  %v1730_v2 = vld [vmem:[#allocation4 + $0x5] sm:$0x7]  ;;  %vm640_vm5 = vcmask 253952  }
 0x321   :  { %v369_v5 = vsub.f32 1.0, %v368_v3  ;;  %v1732_v3 = vpop.f32.mrf.mxu2 }
 0x322   :  { %v355_v7 = vmul.f32 %v1475_v0, %v354_v4  ;;  %v70_v4 = vperm.slane %v1661_v20, 0 }
 0x323   :  { %v370_v11 = vmul.f32 %v1477_v1, %v369_v5  ;;  %v1736_v5 = vperm.slane %v1730_v2, 0 }
 0x324   :  { %v356_v12 = vadd.f32 %v1475_v0, %v355_v7  ;;  %v1739_v7 = vadd.f32 %v1663_v21, %v70_v4  ;;  %v200_v21 = vld [vmem:[#allocation2 + $0x148] sm:$0xff] }
 0x325   :  { %v371_v16 = vadd.f32 %v1477_v1, %v370_v11  ;;  %v71_v11 = vperm.slane %v1661_v20, 1  ;;  %549 = vmatpush.msra.mxu0 %v200_v21 }
 0x326   :  { %v360_v15 = vsel %vm359_vm3, %v1475_v0, %v356_v12 }
 0x327   :  { %v365_v17 = vsel %vm362_vm4, %v364_v14, %v360_v15  ;;  %v375_v23 = vsel %vm374_vm7, %v1477_v1, %v371_v16  ;;  %v121_v1 = vpop.f32.mrf.mxu1  ;;  %v1745_v14 = vperm.slane %v1730_v2, 1 }
 0x328   :  { %v366_v19 = vmul.f32 %v1471_v53, %v365_v17  ;;  %v380_v26 = vsel %vm377_vm8, %v379_v25, %v375_v23  ;;  %v1747_v17 = vadd.f32 %v121_v1, %v71_v11  ;;  %v1751_v23 = vld [vmem:[#allocation2 + $0x158] sm:$0xff] }
 0x329   :  { %v381_v27 = vmul.f32 %v1473_v54, %v380_v26  ;;  %589 = vmatpush.msra.mxu2 %v1751_v23  ;;  %v197_v26 = vld [vmem:[#allocation2 + $0xf0] sm:$0xff] }
 0x32a   :  { %384 = vperm.xlu1 %1459, %v366_v19   ;;  %550 = vmatpush.msra.mxu0 %v197_v26 }
 0x32b   :  { %590 = vmatpush.msra.mxu2 %v1754_v29 }
 0x32c   :  { %551 = vmatpush.msra.mxu0 %v194_v30 }
 0x32d   :  { %591 = vmatpush.msra.mxu2 %v1756_v32 }
 0x32e   :  { %552 = vmatpush.msra.mxu0 %v191_v34 }
 0x330   :  { %874 = vmatpush.msrb.mxu0 %v1698_v41 }
 0x332   :  { %389 = vperm.xlu1 %1459, %v381_v27   ;;  %v198_v27 = vld [vmem:[#allocation2 + $0xf8] sm:$0xff]  ;;  %875 = vmatpush.msrb.mxu0 %v1706_v44 }
 0x333   :  { %570 = vmatpush.msra.mxu1 %v198_v27 }
 0x335   :  { %571 = vmatpush.msra.mxu1 %v195_v31 }
 0x337   :  { %572 = vmatpush.msra.mxu1 %v192_v35 }
 0x39c   :  { %v1716_v46 = vpop.permute.xlu1 %384 }
 0x39d   :  { %v392_v47 = vmul.f32 %v1716_v46, %v1637_v8 }
 0x39f   :  { %v394_v48 = vsel %vm230_vm0, %v392_v47, 0.0  ;;  %v1759_v47 = vld [vmem:[#allocation2 + $0x50] sm:$0xff] }
 0x3a0   :  { %v395_v49 = vrot.slane %v394_v48, 4  ;;  %592 = vmatpush.msra.mxu2 %v1759_v47 }
 0x3a2   :  { %v396_v50 = vadd.f32 %v395_v49, %v394_v48 }
 0x3a4   :  { %v1721_v51 = vpop.permute.xlu1 %389  ;;  %v397_v53 = vrot.slane %v396_v50, 2 }
 0x3a5   :  { %v393_v52 = vmul.f32 %v1721_v51, %v1650_v13 }
 0x3a6   :  { %v398_v56 = vadd.f32 %v397_v53, %v396_v50 }
 0x3a7   :  { %v401_v54 = vsel %vm230_vm0, %v393_v52, 0.0 }
 0x3a8   :  { %v402_v55 = vrot.slane %v401_v54, 4  ;;  %v399_v60 = vrot.slane %v398_v56, 1 }
 0x3aa   :  { %v403_v57 = vadd.f32 %v402_v55, %v401_v54  ;;  %v400_v62 = vadd.f32 %v399_v60, %v398_v56  ;;  %v72_v55 = vperm.slane %v1661_v20, 2 }
 0x3ac   :  { %v404_v58 = vrot.slane %v403_v57, 2 }
 0x3ae   :  { %v405_v59 = vadd.f32 %v404_v58, %v403_v57 }
 0x3b0   :  { %v406_v61 = vrot.slane %v405_v59, 1 }
 0x3b2   :  { %v407_v63 = vadd.f32 %v406_v61, %v405_v59  ;;  %v1769_v59 = vperm.slane %v1730_v2, 2 }
 0x3b4   :  { %v417_v0 = vsel %vm314_vm13, %v407_v63, %v400_v62 }
 0x3b5   :  { %1427 = vmatmul.msk.f32.vlgmr.msrb.gmra.mxu1 %vm230_vm0, %v417_v0  ;;  %1428 = vmatmul.msk.f32.vlgmr.msrb.gmra.mxu2 %vm230_vm0, %v417_v0 }
 0x3b6   :  { %1429 = vmatmul.msk.f32.vlgmr.msrb.gmra.mxu3 %vm230_vm0, %v417_v0  ;;  %894 = vmatpush.msrb.mxu1 %v1704_v43  ;;  %v1772_v0 = vadd.f32 %v1732_v3, %v72_v55 }
 0x3b7   :  { %993 = vmatpush.msrb.mxu3 %v201_v22  ;;  %973 = vmatpush.msrb.mxu2 %v200_v21 }
 0x3b8   :  { %895 = vmatpush.msrb.mxu1 %v1708_v45 }
 0x3b9   :  { %994 = vmatpush.msrb.mxu3 %v198_v27  ;;  %974 = vmatpush.msrb.mxu2 %v197_v26 }
 0x3bb   :  { %995 = vmatpush.msrb.mxu3 %v195_v31  ;;  %975 = vmatpush.msrb.mxu2 %v194_v30 }
 0x3bd   :  { %996 = vmatpush.msrb.mxu3 %v192_v35  ;;  %976 = vmatpush.msrb.mxu2 %v191_v34 }
 0x432   :  { %v437_v6 = vpop.f32.mrf.mxu1 }
 0x433   :  { %v438_v10 = vadd.f32 %v437_v6, %v1736_v5 }
 0x435   :  { %v480_v12 = vadd.f32 %v438_v10, %v1739_v7 }
 0x437   :  { %v1430_v15 = vmul.f32 -1.442695, %v480_v12 }
 0x438   :  { %v457_v16 = vpop.f32.mrf.mxu2 }
 0x439   :  { %1478 = vpow2.f32 %v1430_v15  ;;  %v458_v18 = vadd.f32 %v457_v16, %v1745_v14  ;;  %v477_v61 = vpop.f32.mrf.mxu3 }
 0x43a   :  { %v478_v20 = vadd.f32 %v477_v61, %v1769_v59 }
 0x43b   :  { %v500_v19 = vadd.f32 %v458_v18, %v1747_v17 }
 0x43d   :  { %v1431_v25 = vmul.f32 -1.442695, %v500_v19 }
 0x43f   :  { %v1479_v33 = vpop.eup %1478  ;;  %1480 = vpow2.f32 %v1431_v25 }
 0x440   :  { %v484_v36 = vadd.f32 1.0, %v1479_v33 }
 0x442   :  { %1482 = vrcp.f32 %v484_v36  ;;  %v496_v54 = vand.u32 2147483648, %v484_v36  ;;  %v494_v57 = vand.u32 2147483647, %v484_v36  ;;  %vm490_vm10 = vweird.f32 %v484_v36 }
 0x444   :  { %v497_v63 = vor.u32 1.1754944e-38, %v496_v54  ;;  %vm495_vm12 = vcmp.eq.f32.partialorder %v494_v57, 8.507059e+37 }
 0x445   :  { %v1481_v48 = vpop.eup %1480 }
 0x446   :  { %v504_v49 = vadd.f32 1.0, %v1481_v48 }
 0x448   :  { %v1483_v50 = vpop.eup %1482  ;;  %1484 = vrcp.f32 %v504_v49  ;;  %v516_v11 = vand.u32 2147483648, %v504_v49  ;;  %v514_v12 = vand.u32 2147483647, %v504_v49  ;;  %vm510_vm2 = vweird.f32 %v504_v49 }
 0x449   :  { %v486_v52 = vmul.f32 %v1483_v50, %v484_v36  ;;  %vm491_vm9 = vweird.f32 %v1483_v50 }
 0x44a   :  { %vm492_vm11 = vmor %vm490_vm10, %vm491_vm9  ;;  %v517_v19 = vor.u32 1.1754944e-38, %v516_v11  ;;  %vm515_vm4 = vcmp.eq.f32.partialorder %v514_v12, 8.507059e+37  ;;  %vm681_vm10 = vcmask 125954  }
 0x44b   :  { %v487_v53 = vsub.f32 1.0, %v486_v52 }
 0x44d   :  { %v488_v56 = vmul.f32 %v1483_v50, %v487_v53 }
 0x44e   :  { %v1485_v58 = vpop.eup %1484 }
 0x44f   :  { %v506_v60 = vmul.f32 %v1485_v58, %v504_v49  ;;  %v489_v62 = vadd.f32 %v1483_v50, %v488_v56  ;;  %vm511_vm15 = vweird.f32 %v1485_v58 }
 0x450   :  { %vm512_vm3 = vmor %vm510_vm2, %vm511_vm15 }
 0x451   :  { %v507_v1 = vsub.f32 1.0, %v506_v60  ;;  %v493_v4 = vsel %vm492_vm11, %v1483_v50, %v489_v62 }
 0x452   :  { %v498_v6 = vsel %vm495_vm12, %v497_v63, %v493_v4 }
 0x453   :  { %v508_v10 = vmul.f32 %v1485_v58, %v507_v1  ;;  %v520_v2 = vmul.f32 %v498_v6, %v1772_v0 }
 0x455   :  { %v509_v15 = vadd.f32 %v1485_v58, %v508_v10  ;;  %v521_v16 = vadd.f32 %v520_v2, %v478_v20 }
 0x457   :  { %v513_v18 = vsel %vm512_vm3, %v1485_v58, %v509_v15  ;;  %1486 = vtanh.f32 %v521_v16 }
 0x458   :  { %v518_v3 = vsel %vm515_vm4, %v517_v19, %v513_v18 }
 0x459   :  { %v523_v21 = vsub.f32 1.0, %v518_v3  ;;  %v525_v26 = vmul.f32 %v518_v3, %v1642_v9  ;;  %v1796_v9 = vld [vmem:[#allocation4 + $0x8] sm:$0x7] }
 0x45a   :  { %v528_v31 = vperm.slane %v1796_v9, 0  ;;  %v529_v48 = vperm.slane %v1796_v9, 1 }
 0x45d   :  { %v1487_v22 = vpop.eup %1486 }
 0x45e   :  { %v524_v25 = vmul.f32 %v1487_v22, %v523_v21 }
 0x460   :  { %v526_v27 = vadd.f32 %v525_v26, %v524_v25  ;;  %v662_v26 = vperm.slane %v1675_v40, 0 }
 0x462   :  { %1432 = vmatmul.msk.f32.vlgmr.msra.gmra.mxu0 %vm80_vm1, %v526_v27  ;;  %1433 = vmatmul.msk.f32.vlgmr.msra.gmra.mxu1 %vm80_vm1, %v526_v27  ;;  %641 = vst.msk [vmem:[%s1982_s4] sm:$0x1] %vm640_vm5, %v526_v27  ;;  %v638_v30 = vrot.slane %v526_v27, 1 }
 0x463   :  { %1434 = vmatmul.msk.f32.vlgmr.msra.gmra.mxu2 %vm80_vm1, %v526_v27  ;;  %1013 = vmatpush.msra.mxu0 %v1751_v23 }
 0x464   :  { %642 = vst.msk [vmem:[%s1982_s4 + $0x4] sm:$0x1] %vm640_vm5, %v638_v30  ;;  %1276 = vmatpush.msra.mxu1 %v1696_v38  ;;  %1296 = vmatpush.msra.mxu2 %v1698_v41 }
 0x465   :  { %1014 = vmatpush.msra.mxu0 %v1754_v29 }
 0x466   :  { %1277 = vmatpush.msra.mxu1 %v1700_v42  ;;  %1297 = vmatpush.msra.mxu2 %v1706_v44 }
 0x467   :  { %1015 = vmatpush.msra.mxu0 %v1756_v32 }
 0x469   :  { %1016 = vmatpush.msra.mxu0 %v1759_v47 }
 0x4df   :  { %v554_v33 = vpop.f32.mrf.mxu0  ;;  %v574_v50 = vpop.f32.mrf.mxu1 }
 0x4e0   :  { %v555_v38 = vadd.f32 %v554_v33, %v528_v31  ;;  %v575_v55 = vadd.f32 %v574_v50, %v529_v48 }
 0x4e2   :  { %v1435_v34 = vmul.f32 -1.442695, %v555_v38  ;;  %v625_v62 = vrot.slane %v575_v55, 1  ;;  %v626_v4 = vperm.slane %v575_v55, 0 }
 0x4e4   :  { %1488 = vpow2.f32 %v1435_v34  ;;  %v627_v6 = vperm.slane %v625_v62, 0  ;;  %v630_v11 = vmul.f32 %v626_v4, %v1716_v46 }
 0x4e6   :  { %v631_v15 = vmul.f32 %v627_v6, %v1721_v51 }
 0x4ea   :  { %v1489_v41 = vpop.eup %1488 }
 0x4eb   :  { %v600_v35 = vadd.f32 1.0, %v1489_v41 }
 0x4ed   :  { %1490 = vrcp.f32 %v600_v35  ;;  %v612_v49 = vand.u32 2147483648, %v600_v35  ;;  %v610_v53 = vand.u32 2147483647, %v600_v35  ;;  %vm606_vm7 = vweird.f32 %v600_v35 }
 0x4ef   :  { %v613_v56 = vor.u32 1.1754944e-38, %v612_v49  ;;  %vm611_vm9 = vcmp.eq.f32.partialorder %v610_v53, 8.507059e+37 }
 0x4f3   :  { %v1491_v42 = vpop.eup %1490 }
 0x4f4   :  { %v602_v36 = vmul.f32 %v1491_v42, %v600_v35  ;;  %vm607_vm6 = vweird.f32 %v1491_v42 }
 0x4f5   :  { %vm608_vm8 = vmor %vm606_vm7, %vm607_vm6 }
 0x4f6   :  { %v603_v44 = vsub.f32 1.0, %v602_v36 }
 0x4f8   :  { %v604_v52 = vmul.f32 %v1491_v42, %v603_v44 }
 0x4fa   :  { %v605_v54 = vadd.f32 %v1491_v42, %v604_v52 }
 0x4fc   :  { %v609_v57 = vsel %vm608_vm8, %v1491_v42, %v605_v54 }
 0x4fd   :  { %v614_v58 = vsel %vm611_vm9, %v613_v56, %v609_v57  ;;  %vm1103_vm9 = vcmask 128004  }
 0x4fe   :  { %v617_v60 = vrot.slane %v614_v58, 1  ;;  %v618_v61 = vperm.slane %v614_v58, 0 }
 0x500   :  { %v619_v63 = vperm.slane %v617_v60, 0  ;;  %v622_v1 = vmul.f32 %v618_v61, %v1716_v46 }
 0x502   :  { %v623_v20 = vmul.f32 %v619_v63, %v1721_v51  ;;  %v632_v10 = vsub.f32 1.0, %v622_v1 }
 0x504   :  { %v633_v2 = vsub.f32 1.0, %v623_v20  ;;  %v634_v12 = vmul.f32 %v632_v10, %v1637_v8  ;;  %v682_v8 = vsel %vm681_vm10, %v1667_v28, 0.0 }
 0x506   :  { %v635_v16 = vmul.f32 %v633_v2, %v1650_v13  ;;  %v1810_v18 = vadd.f32 %v634_v12, %v630_v11  ;;  %v661_v13 = vperm.slane %v1673_v39, 0 }
 0x508   :  { %v1812_v19 = vadd.f32 %v635_v16, %v631_v15  ;;  %v673_v3 = vmul.f32 %v1810_v18, %v1810_v18  ;;  %v665_v51 = vmul.f32 %v661_v13, %v1810_v18 }
 0x50a   :  { %v675_v21 = vsel %vm230_vm0, %v673_v3, 0.0  ;;  %v674_v22 = vmul.f32 %v1812_v19, %v1812_v19  ;;  %v667_v25 = vsel %vm230_vm0, %v665_v51, 0.0  ;;  %v666_v27 = vmul.f32 %v662_v26, %v1812_v19 }
 0x50b   :  { %676 = vadd.xlane.f32.xlu1 %v675_v21 }
 0x50c   :  { %v678_v46 = vsel %vm230_vm0, %v674_v22, 0.0  ;;  %v670_v30 = vsel %vm230_vm0, %v666_v27, 0.0  ;;  %v727_v22 = vperm.slane %v1678_v24, 2 }
 0x50d   :  { %679 = vadd.xlane.f32.xlu2 %v678_v46  ;;  %v728_v46 = vperm.slane %v1678_v24, 3 }
 0x515   :  { %683 = vadd.xlane.f32.xlu2 %v682_v8 }
 0x51d   :  { %668 = vadd.xlane.f32.xlu2 %v667_v25 }
 0x525   :  { %671 = vadd.xlane.f32.xlu2 %v670_v30 }
 0x57e   :  { %v677_v33 = vpop.xlane.xlu1 %676 }
 0x57f   :  { %v685_v38 = vmax.f32 %v677_v33, 1e-16 }
 0x580   :  { %v680_v34 = vpop.xlane.xlu2 %679 }
 0x581   :  { %1492 = vrsqrt.f32 %v685_v38  ;;  %v686_v41 = vmax.f32 %v680_v34, 1e-16  ;;  %vm693_vm2 = vweird.f32 %v685_v38 }
 0x583   :  { %1494 = vrsqrt.f32 %v686_v41  ;;  %vm703_vm4 = vweird.f32 %v686_v41 }
 0x587   :  { %v1493_v35 = vpop.eup %1492 }
 0x588   :  { %v688_v39 = vmul.f32 %v1493_v35, %v685_v38  ;;  %v684_v42 = vpop.xlane.xlu2 %683  ;;  %vm694_vm11 = vweird.f32 %v1493_v35 }
 0x589   :  { %v1495_v36 = vpop.eup %1494  ;;  %v709_v44 = vmax.f32 %v684_v42, 1e-16  ;;  %vm695_vm3 = vmor %vm693_vm2, %vm694_vm11 }
 0x58a   :  { %v689_v49 = vmul.f32 %v1493_v35, %v688_v39  ;;  %v698_v50 = vmul.f32 %v1495_v36, %v686_v41  ;;  %vm704_vm12 = vweird.f32 %v1495_v36 }
 0x58b   :  { %1496 = vrsqrt.f32 %v709_v44  ;;  %vm716_vm6 = vweird.f32 %v709_v44  ;;  %vm705_vm7 = vmor %vm703_vm4, %vm704_vm12 }
 0x58c   :  { %v699_v40 = vmul.f32 %v1495_v36, %v698_v50  ;;  %v690_v52 = vmul.f32 0.5, %v689_v49 }
 0x58e   :  { %v700_v53 = vmul.f32 0.5, %v699_v40  ;;  %v691_v57 = vsub.f32 1.5, %v690_v52 }
 0x590   :  { %v669_v54 = vpop.xlane.xlu2 %668  ;;  %v701_v60 = vsub.f32 1.5, %v700_v53  ;;  %v692_v62 = vmul.f32 %v1493_v35, %v691_v57 }
 0x591   :  { %v1497_v55 = vpop.eup %1496 }
 0x592   :  { %v711_v56 = vmul.f32 %v1497_v55, %v709_v44  ;;  %vm717_vm15 = vweird.f32 %v1497_v55  ;;  %v702_v1 = vmul.f32 %v1495_v36, %v701_v60  ;;  %v696_v4 = vsel %vm695_vm3, %v1493_v35, %v692_v62 }
 0x593   :  { %vm718_vm8 = vmor %vm716_vm6, %vm717_vm15  ;;  %v707_v12 = vmul.f32 %v696_v4, %v669_v54 }
 0x594   :  { %v712_v58 = vmul.f32 %v1497_v55, %v711_v56  ;;  %v706_v11 = vsel %vm705_vm7, %v1495_v36, %v702_v1  ;;  %v1104_v56 = vsel %vm1103_vm9, %v1667_v28, 0.0 }
 0x596   :  { %v713_v61 = vmul.f32 0.5, %v712_v58 }
 0x598   :  { %v714_v63 = vsub.f32 1.5, %v713_v61  ;;  %v672_v6 = vpop.xlane.xlu2 %671 }
 0x599   :  { %v708_v16 = vmul.f32 %v706_v11, %v672_v6 }
 0x59a   :  { %v715_v20 = vmul.f32 %v1497_v55, %v714_v63 }
 0x59c   :  { %v719_v10 = vsel %vm718_vm8, %v1497_v55, %v715_v20 }
 0x59d   :  { %v721_v2 = vperm.slane %v719_v10, 2  ;;  %v722_v15 = vperm.slane %v719_v10, 3 }
 0x59f   :  { %v725_v3 = vmul.f32 %v721_v2, %v707_v12  ;;  %v726_v21 = vmul.f32 %v722_v15, %v708_v16 }
 0x5a1   :  { %v731_v8 = vmul.f32 %v727_v22, %v725_v3  ;;  %v732_v13 = vmul.f32 %v728_v46, %v726_v21 }
 0x5a3   :  { %736 = vperm.xlu0 %1458, %v731_v8   ;;  %739 = vperm.xlu2 %1457, %v732_v13  }
 0x5fd   :  { %v740_v51 = vpop.permute.xlu2 %739 }
 0x5fe   :  { %v742_v26 = vperm.slane %v740_v51, %v1682_v37 }
 0x615   :  { %v737_v25 = vpop.permute.xlu0 %736 }
 0x616   :  { %v741_v27 = vperm.slane %v737_v25, %v1682_v37 }
 0x618   :  { %v743_v30 = vsel %vm314_vm13, %v742_v26, %v741_v27 }
 0x619   :  { %v745_v33 = vsel %vm317_vm14, %v743_v30, -inf }
 0x61a   :  { %746 = vmax.xlane.f32.xlu1 %v745_v33 }
 0x68d   :  { %v747_v38 = vpop.xlane.xlu1 %746 }
 0x68e   :  { %v749_v34 = vperm.slane %v747_v38, 0  ;;  %v750_v41 = vperm.slane %v747_v38, 1 }
 0x690   :  { %v753_v35 = vsub.f32 %v731_v8, %v749_v34  ;;  %v754_v39 = vsub.f32 %v732_v13, %v750_v41 }
 0x692   :  { %v755_v42 = vmul.f32 1.442695, %v753_v35  ;;  %v757_v36 = vmul.f32 1.442695, %v754_v39 }
 0x694   :  { %1498 = vpow2.f32 %v755_v42 }
 0x695   :  { %1500 = vpow2.f32 %v757_v36 }
 0x69a   :  { %v1499_v44 = vpop.eup %1498 }
 0x69b   :  { %v1501_v49 = vpop.eup %1500  ;;  %762 = vperm.xlu0 %1458, %v1499_v44  }
 0x69c   :  { %765 = vperm.xlu1 %1459, %v1501_v49  }
 0x70d   :  { %v763_v50 = vpop.permute.xlu0 %762 }
 0x70e   :  { %v766_v40 = vpop.permute.xlu1 %765  ;;  %v767_v52 = vperm.slane %v763_v50, %v1682_v37 }
 0x70f   :  { %v768_v53 = vperm.slane %v766_v40, %v1682_v37 }
 0x711   :  { %v769_v54 = vsel %vm314_vm13, %v768_v53, %v767_v52 }
 0x712   :  { %v771_v55 = vsel %vm317_vm14, %v769_v54, 0.0 }
 0x713   :  { %772 = vadd.xlane.f32.xlu0 %v771_v55 }
 0x71b   :  { %1105 = vadd.xlane.f32.xlu0 %v1104_v56 }
 0x786   :  { %v773_v57 = vpop.xlane.xlu0 %772 }
 0x787   :  { %v775_v58 = vperm.slane %v773_v57, 0  ;;  %v776_v60 = vperm.slane %v773_v57, 1 }
 0x789   :  { %1502 = vrcp.f32 %v775_v58  ;;  %v790_v6 = vand.u32 2147483648, %v775_v58  ;;  %v788_v11 = vand.u32 2147483647, %v775_v58  ;;  %vm784_vm11 = vweird.f32 %v775_v58 }
 0x78a   :  { %1504 = vrcp.f32 %v776_v60  ;;  %v805_v21 = vand.u32 2147483648, %v776_v60  ;;  %vm799_vm3 = vweird.f32 %v776_v60  ;;  %v803_v46 = vand.u32 2147483647, %v776_v60 }
 0x78b   :  { %v791_v28 = vor.u32 1.1754944e-38, %v790_v6  ;;  %vm789_vm15 = vcmp.eq.f32.partialorder %v788_v11, 8.507059e+37 }
 0x78c   :  { %v806_v13 = vor.u32 1.1754944e-38, %v805_v21  ;;  %vm804_vm6 = vcmp.eq.f32.partialorder %v803_v46, 8.507059e+37  ;;  %v947_v46 = vrot.slane %v1772_v0, 2 }
 0x78f   :  { %v1503_v61 = vpop.eup %1502 }
 0x790   :  { %v1505_v62 = vpop.eup %1504  ;;  %v780_v63 = vmul.f32 %v1503_v61, %v775_v58  ;;  %vm785_vm10 = vweird.f32 %v1503_v61  ;;  %v924_v58 = vrot.slane %v1747_v17, 2 }
 0x791   :  { %v795_v1 = vmul.f32 %v1505_v62, %v776_v60  ;;  %vm786_vm12 = vmor %vm784_vm11, %vm785_vm10  ;;  %vm800_vm2 = vweird.f32 %v1505_v62 }
 0x792   :  { %v781_v4 = vsub.f32 1.0, %v780_v63  ;;  %vm801_vm4 = vmor %vm799_vm3, %vm800_vm2 }
 0x793   :  { %v796_v20 = vsub.f32 1.0, %v795_v1 }
 0x794   :  { %v782_v10 = vmul.f32 %v1503_v61, %v781_v4 }
 0x795   :  { %v797_v2 = vmul.f32 %v1505_v62, %v796_v20 }
 0x796   :  { %v783_v12 = vadd.f32 %v1503_v61, %v782_v10 }
 0x797   :  { %v798_v16 = vadd.f32 %v1505_v62, %v797_v2 }
 0x798   :  { %v787_v15 = vsel %vm786_vm12, %v1503_v61, %v783_v12 }
 0x799   :  { %v792_v3 = vsel %vm789_vm15, %v791_v28, %v787_v15  ;;  %v802_v8 = vsel %vm801_vm4, %v1505_v62, %v798_v16 }
 0x79a   :  { %v793_v22 = vmul.f32 %v1499_v44, %v792_v3  ;;  %v807_v51 = vsel %vm804_vm6, %v806_v13, %v802_v8 }
 0x79b   :  { %v808_v25 = vmul.f32 %v1501_v49, %v807_v51 }
 0x79c   :  { %811 = vperm.xlu2 %1457, %v793_v22  }
 0x7a4   :  { %816 = vperm.xlu2 %1457, %v808_v25  }
 0x7f6   :  { %v1838_v26 = vpop.permute.xlu2 %811 }
 0x7f7   :  { %v819_v27 = vmul.f32 %v1838_v26, %v1810_v18 }
 0x7f9   :  { %v821_v30 = vsel %vm230_vm0, %v819_v27, 0.0 }
 0x7fa   :  { %v822_v33 = vrot.slane %v821_v30, 4 }
 0x7fc   :  { %v823_v38 = vadd.f32 %v822_v33, %v821_v30 }
 0x7fe   :  { %v1843_v34 = vpop.permute.xlu2 %816  ;;  %v824_v35 = vrot.slane %v823_v38, 2 }
 0x7ff   :  { %v820_v41 = vmul.f32 %v1843_v34, %v1812_v19 }
 0x800   :  { %v825_v36 = vadd.f32 %v824_v35, %v823_v38 }
 0x801   :  { %v828_v39 = vsel %vm230_vm0, %v820_v41, 0.0 }
 0x802   :  { %v829_v42 = vrot.slane %v828_v39, 4  ;;  %v826_v50 = vrot.slane %v825_v36, 1 }
 0x804   :  { %v830_v44 = vadd.f32 %v829_v42, %v828_v39  ;;  %v827_v53 = vadd.f32 %v826_v50, %v825_v36  ;;  %v1867_v42 = vld [vmem:[%s1978_s0] sm:$0x3f] }
 0x805   :  { %v954_v36 = vrot.slane %v1867_v42, 2 }
 0x806   :  { %v831_v49 = vrot.slane %v830_v44, 2 }
 0x808   :  { %v832_v40 = vadd.f32 %v831_v49, %v830_v44 }
 0x80a   :  { %v833_v52 = vrot.slane %v832_v40, 1 }
 0x80c   :  { %v834_v54 = vadd.f32 %v833_v52, %v832_v40 }
 0x80e   :  { %v837_v55 = vsel %vm314_vm13, %v834_v54, %v827_v53  ;;  %v1881_v54 = vpop.f32.mrf.mxu2 }
 0x80f   :  { %1436 = vmatmul.msk.f32.vlgmr.msra.gmra.mxu3 %vm230_vm0, %v837_v55  ;;  %1437 = vmatmul.msk.f32.vlgmr.msrb.gmra.mxu0 %vm230_vm0, %v837_v55 }
 0x810   :  { %1438 = vmatmul.msk.f32.vlgmr.msrb.gmra.mxu1 %vm230_vm0, %v837_v55  ;;  %1316 = vmatpush.msra.mxu3 %v1704_v43 }
 0x811   :  { %1392 = vmatpush.msrb.mxu0 %v1751_v23  ;;  %v901_v23 = vrot.slane %v1739_v7, 2 }
 0x812   :  { %1317 = vmatpush.msra.mxu3 %v1708_v45 }
 0x813   :  { %1393 = vmatpush.msrb.mxu0 %v1754_v29 }
 0x815   :  { %1394 = vmatpush.msrb.mxu0 %v1756_v32 }
 0x817   :  { %1395 = vmatpush.msrb.mxu0 %v1759_v47 }
 0x88c   :  { %v877_v56 = vpop.f32.mrf.mxu0 }
 0x88d   :  { %v878_v57 = vadd.f32 %v877_v56, %v1745_v14  ;;  %v897_v21 = vpop.f32.mrf.mxu1 }
 0x88e   :  { %v898_v27 = vadd.f32 %v897_v21, %v1769_v59 }
 0x88f   :  { %v926_v60 = vadd.f32 %v924_v58, %v878_v57 }
 0x891   :  { %v1440_v61 = vmul.f32 -1.442695, %v926_v60 }
 0x892   :  { %v857_v62 = vpop.f32.mrf.mxu3 }
 0x893   :  { %1506 = vpow2.f32 %v1440_v61  ;;  %v858_v43 = vadd.f32 %v857_v62, %v1736_v5 }
 0x895   :  { %v903_v45 = vadd.f32 %v901_v23, %v858_v43 }
 0x897   :  { %v1439_v63 = vmul.f32 -1.442695, %v903_v45 }
 0x899   :  { %v1507_v29 = vpop.eup %1506  ;;  %1508 = vpow2.f32 %v1439_v63 }
 0x89a   :  { %v930_v32 = vadd.f32 1.0, %v1507_v29 }
 0x89c   :  { %1510 = vrcp.f32 %v930_v32  ;;  %v942_v25 = vand.u32 2147483648, %v930_v32  ;;  %vm936_vm12 = vweird.f32 %v930_v32  ;;  %v940_v33 = vand.u32 2147483647, %v930_v32 }
 0x89e   :  { %v943_v35 = vor.u32 1.1754944e-38, %v942_v25  ;;  %vm941_vm2 = vcmp.eq.f32.partialorder %v940_v33, 8.507059e+37  ;;  %v1082_v33 = vld [vmem:[#allocation1 + $0x5] ss:$9 sm:$0xff] }
 0x89f   :  { %v1509_v47 = vpop.eup %1508 }
 0x8a0   :  { %v907_v1 = vadd.f32 1.0, %v1509_v47 }
 0x8a2   :  { %1512 = vrcp.f32 %v907_v1  ;;  %v1511_v4 = vpop.eup %1510  ;;  %v919_v12 = vand.u32 2147483648, %v907_v1  ;;  %v917_v15 = vand.u32 2147483647, %v907_v1  ;;  %vm913_vm8 = vweird.f32 %v907_v1 }
 0x8a3   :  { %v932_v20 = vmul.f32 %v1511_v4, %v930_v32  ;;  %vm937_vm11 = vweird.f32 %v1511_v4 }
 0x8a4   :  { %v920_v22 = vor.u32 1.1754944e-38, %v919_v12  ;;  %vm918_vm10 = vcmp.eq.f32.partialorder %v917_v15, 8.507059e+37  ;;  %vm938_vm15 = vmor %vm936_vm12, %vm937_vm11 }
 0x8a5   :  { %v933_v11 = vsub.f32 1.0, %v932_v20 }
 0x8a7   :  { %v934_v16 = vmul.f32 %v1511_v4, %v933_v11 }
 0x8a8   :  { %v1513_v6 = vpop.eup %1512 }
 0x8a9   :  { %v909_v10 = vmul.f32 %v1513_v6, %v907_v1  ;;  %vm914_vm7 = vweird.f32 %v1513_v6  ;;  %v935_v51 = vadd.f32 %v1511_v4, %v934_v16 }
 0x8aa   :  { %vm915_vm9 = vmor %vm913_vm8, %vm914_vm7 }
 0x8ab   :  { %v910_v2 = vsub.f32 1.0, %v909_v10  ;;  %v939_v41 = vsel %vm938_vm15, %v1511_v4, %v935_v51 }
 0x8ac   :  { %v944_v39 = vsel %vm941_vm2, %v943_v35, %v939_v41 }
 0x8ad   :  { %v911_v28 = vmul.f32 %v1513_v6, %v910_v2  ;;  %v952_v44 = vsub.f32 1.0, %v944_v39  ;;  %v956_v40 = vmul.f32 %v954_v36, %v944_v39  ;;  %v1106_v39 = vpop.xlane.xlu0 %1105 }
 0x8ae   :  { %v1131_v36 = vmax.f32 %v1106_v39, 1e-16 }
 0x8af   :  { %v912_v3 = vadd.f32 %v1513_v6, %v911_v28 }
 0x8b1   :  { %v916_v8 = vsel %vm915_vm9, %v1513_v6, %v912_v3  ;;  %v1080_v3 = vld [vmem:[#allocation1 + $0x4] ss:$9 sm:$0xff]  ;;  %vm1138_vm9 = vweird.f32 %v1131_v36 }
 0x8b2   :  { %v921_v13 = vsel %vm918_vm10, %v920_v22, %v916_v8 }
 0x8b3   :  { %v949_v30 = vmul.f32 %v947_v46, %v921_v13  ;;  %v1083_v13 = vperm.slane %v1080_v3, 0  ;;  %v1149_v3 = vperm.slane %v1678_v24, 4 }
 0x8b5   :  { %v950_v38 = vadd.f32 %v949_v30, %v898_v27 }
 0x8b7   :  { %1514 = vtanh.f32 %v950_v38 }
 0x8bd   :  { %v1515_v49 = vpop.eup %1514 }
 0x8be   :  { %v953_v50 = vmul.f32 %v1515_v49, %v952_v44 }
 0x8c0   :  { %v957_v52 = vadd.f32 %v956_v40, %v953_v50 }
 0x8c2   :  { %1441 = vmatmul.msk.f32.vlgmr.msrb.gmra.mxu2 %vm80_vm1, %v957_v52  ;;  %1442 = vmatmul.msk.f32.vlgmr.msrb.gmra.mxu3 %vm80_vm1, %v957_v52  ;;  %1064 = vst.msk [vmem:[%s1982_s4 + $0x1] sm:$0x1] %vm640_vm5, %v957_v52  ;;  %v1062_v53 = vrot.slane %v957_v52, 1 }
 0x8c3   :  { %1443 = vmatmul.msk.f32.vlgmr.msra.gmra.mxu0 %vm80_vm1, %v957_v52 }
 0x8c4   :  { %1065 = vst.msk [vmem:[%s1982_s4 + $0x5] sm:$0x1] %vm640_vm5, %v1062_v53 }
 0x945   :  { %v978_v55 = vpop.f32.mrf.mxu2  ;;  %v998_v45 = vpop.f32.mrf.mxu3 }
 0x946   :  { %v979_v56 = vadd.f32 %v978_v55, %v528_v31  ;;  %v999_v47 = vadd.f32 %v998_v45, %v529_v48 }
 0x948   :  { %v1444_v57 = vmul.f32 -1.442695, %v979_v56  ;;  %v1049_v6 = vrot.slane %v999_v47, 1  ;;  %v1050_v2 = vperm.slane %v999_v47, 0 }
 0x94a   :  { %1516 = vpow2.f32 %v1444_v57  ;;  %v1051_v28 = vperm.slane %v1049_v6, 0  ;;  %v1054_v21 = vmul.f32 %v1050_v2, %v1838_v26 }
 0x94c   :  { %v1055_v46 = vmul.f32 %v1051_v28, %v1843_v34 }
 0x950   :  { %v1517_v58 = vpop.eup %1516 }
 0x951   :  { %v1024_v60 = vadd.f32 1.0, %v1517_v58 }
 0x953   :  { %1518 = vrcp.f32 %v1024_v60  ;;  %v1036_v23 = vand.u32 2147483648, %v1024_v60  ;;  %v1034_v29 = vand.u32 2147483647, %v1024_v60  ;;  %vm1030_vm4 = vweird.f32 %v1024_v60 }
 0x954   :  { %1520 = vrsqrt.f32 %v1131_v36 }
 0x955   :  { %v1037_v31 = vor.u32 1.1754944e-38, %v1036_v23  ;;  %vm1035_vm7 = vcmp.eq.f32.partialorder %v1034_v29, 8.507059e+37 }
 0x959   :  { %v1519_v61 = vpop.eup %1518 }
 0x95a   :  { %v1026_v62 = vmul.f32 %v1519_v61, %v1024_v60  ;;  %vm1031_vm3 = vweird.f32 %v1519_v61  ;;  %v1521_v44 = vpop.eup %1520 }
 0x95b   :  { %vm1032_vm6 = vmor %vm1030_vm4, %vm1031_vm3  ;;  %v1133_v49 = vmul.f32 %v1521_v44, %v1131_v36  ;;  %vm1139_vm8 = vweird.f32 %v1521_v44 }
 0x95c   :  { %v1027_v43 = vsub.f32 1.0, %v1026_v62  ;;  %vm1140_vm10 = vmor %vm1138_vm9, %vm1139_vm8 }
 0x95d   :  { %v1134_v40 = vmul.f32 %v1521_v44, %v1133_v49 }
 0x95e   :  { %v1028_v63 = vmul.f32 %v1519_v61, %v1027_v43 }
 0x95f   :  { %v1135_v56 = vmul.f32 0.5, %v1134_v40 }
 0x960   :  { %v1029_v32 = vadd.f32 %v1519_v61, %v1028_v63 }
 0x961   :  { %v1136_v58 = vsub.f32 1.5, %v1135_v56 }
 0x962   :  { %v1033_v1 = vsel %vm1032_vm6, %v1519_v61, %v1029_v32 }
 0x963   :  { %v1038_v4 = vsel %vm1035_vm7, %v1037_v31, %v1033_v1  ;;  %v1137_v45 = vmul.f32 %v1521_v44, %v1136_v58 }
 0x964   :  { %v1042_v20 = vperm.slane %v1038_v4, 0  ;;  %v1041_v10 = vrot.slane %v1038_v4, 1 }
 0x965   :  { %v1141_v31 = vsel %vm1140_vm10, %v1521_v44, %v1137_v45 }
 0x966   :  { %v1046_v11 = vmul.f32 %v1042_v20, %v1838_v26  ;;  %v1043_v12 = vperm.slane %v1041_v10, 0  ;;  %v1143_v10 = vperm.slane %v1141_v31, 4 }
 0x968   :  { %v1056_v15 = vsub.f32 1.0, %v1046_v11  ;;  %v1047_v16 = vmul.f32 %v1043_v12, %v1843_v34 }
 0x96a   :  { %v1058_v48 = vmul.f32 %v1056_v15, %v1810_v18  ;;  %v1057_v22 = vsub.f32 1.0, %v1047_v16  ;;  %v1144_v15 = vperm.slane %v1141_v31, 5 }
 0x96c   :  { %v1892_v8 = vadd.f32 %v1058_v48, %v1054_v21  ;;  %v1059_v51 = vmul.f32 %v1057_v22, %v1812_v19  ;;  %v1084_v19 = vperm.slane %v1082_v33, 0  ;;  %v1150_v22 = vperm.slane %v1678_v24, 5 }
 0x96e   :  { %v1095_v25 = vmul.f32 %v1892_v8, %v1892_v8  ;;  %v1087_v27 = vmul.f32 %v1083_v13, %v1892_v8  ;;  %v1898_v30 = vadd.f32 %v1059_v51, %v1055_v46 }
 0x970   :  { %v1097_v26 = vsel %vm230_vm0, %v1095_v25, 0.0  ;;  %v1089_v18 = vsel %vm230_vm0, %v1087_v27, 0.0  ;;  %v1096_v34 = vmul.f32 %v1898_v30, %v1898_v30  ;;  %v1088_v41 = vmul.f32 %v1084_v19, %v1898_v30 }
 0x971   :  { %1098 = vadd.xlane.f32.xlu2 %v1097_v26  ;;  %1090 = vadd.xlane.f32.xlu0 %v1089_v18 }
 0x972   :  { %v1100_v38 = vsel %vm230_vm0, %v1096_v34, 0.0  ;;  %v1092_v35 = vsel %vm230_vm0, %v1088_v41, 0.0 }
 0x973   :  { %1101 = vadd.xlane.f32.xlu1 %v1100_v38 }
 0x979   :  { %1093 = vadd.xlane.f32.xlu0 %v1092_v35 }
 0x9e4   :  { %v1099_v50 = vpop.xlane.xlu2 %1098  ;;  %v1091_v43 = vpop.xlane.xlu0 %1090 }
 0x9e5   :  { %v1107_v52 = vmax.f32 %v1099_v50, 1e-16 }
 0x9e6   :  { %v1102_v53 = vpop.xlane.xlu1 %1101 }
 0x9e7   :  { %1522 = vrsqrt.f32 %v1107_v52  ;;  %v1108_v55 = vmax.f32 %v1102_v53, 1e-16  ;;  %vm1115_vm12 = vweird.f32 %v1107_v52 }
 0x9e9   :  { %1524 = vrsqrt.f32 %v1108_v55  ;;  %vm1125_vm3 = vweird.f32 %v1108_v55 }
 0x9ec   :  { %v1094_v12 = vpop.xlane.xlu0 %1093 }
 0x9ed   :  { %v1523_v57 = vpop.eup %1522 }
 0x9ee   :  { %v1110_v60 = vmul.f32 %v1523_v57, %v1107_v52  ;;  %vm1116_vm11 = vweird.f32 %v1523_v57 }
 0x9ef   :  { %v1525_v61 = vpop.eup %1524  ;;  %vm1117_vm2 = vmor %vm1115_vm12, %vm1116_vm11 }
 0x9f0   :  { %v1111_v62 = vmul.f32 %v1523_v57, %v1110_v60  ;;  %v1120_v23 = vmul.f32 %v1525_v61, %v1108_v55  ;;  %vm1126_vm15 = vweird.f32 %v1525_v61 }
 0x9f1   :  { %vm1127_vm4 = vmor %vm1125_vm3, %vm1126_vm15  ;;  %vm653_vm15 = vcmask 516352  }
 0x9f2   :  { %v1112_v63 = vmul.f32 0.5, %v1111_v62  ;;  %v1121_v29 = vmul.f32 %v1525_v61, %v1120_v23 }
 0x9f4   :  { %v1113_v32 = vsub.f32 1.5, %v1112_v63  ;;  %v1122_v47 = vmul.f32 0.5, %v1121_v29 }
 0x9f6   :  { %v1114_v1 = vmul.f32 %v1523_v57, %v1113_v32  ;;  %v1123_v4 = vsub.f32 1.5, %v1122_v47 }
 0x9f8   :  { %v1118_v20 = vsel %vm1117_vm2, %v1523_v57, %v1114_v1  ;;  %v1124_v6 = vmul.f32 %v1525_v61, %v1123_v4  ;;  %v1918_v1 = vperm.slane %v1796_v9, 2 }
 0x9f9   :  { %v1129_v11 = vmul.f32 %v1118_v20, %v1091_v43 }
 0x9fa   :  { %v1128_v2 = vsel %vm1127_vm4, %v1525_v61, %v1124_v6 }
 0x9fb   :  { %v1147_v28 = vmul.f32 %v1143_v10, %v1129_v11  ;;  %v1130_v16 = vmul.f32 %v1128_v2, %v1094_v12 }
 0x9fd   :  { %v1148_v21 = vmul.f32 %v1144_v15, %v1130_v16  ;;  %v1153_v48 = vmul.f32 %v1149_v3, %v1147_v28  ;;  %v595_v15 = vadd.f32 %v1881_v54, %v1918_v1  ;;  %v1018_v3 = vpop.f32.mrf.mxu0 }
 0x9ff   :  { %1158 = vperm.xlu2 %1457, %v1153_v48   ;;  %v1154_v46 = vmul.f32 %v1150_v22, %v1148_v21  ;;  %v644_v9 = vrot.slane %v595_v15, 1  ;;  %v645_v21 = vperm.slane %v595_v15, 0  ;;  %v1019_v22 = vadd.f32 %v1018_v3, %v1918_v1 }
 0xa01   :  { %1161 = vperm.xlu1 %1459, %v1154_v46  }
 0xa59   :  { %v1159_v13 = vpop.permute.xlu2 %1158 }
 0xa5a   :  { %v1163_v25 = vperm.slane %v1159_v13, %v1682_v37  ;;  %v1068_v13 = vperm.slane %v1019_v22, 0 }
 0xa73   :  { %v1162_v51 = vpop.permute.xlu1 %1161 }
 0xa74   :  { %v1164_v27 = vperm.slane %v1162_v51, %v1682_v37 }
 0xa76   :  { %v1165_v33 = vsel %vm314_vm13, %v1164_v27, %v1163_v25 }
 0xa77   :  { %v1167_v26 = vsel %vm317_vm14, %v1165_v33, -inf }
 0xa78   :  { %1168 = vmax.xlane.f32.xlu0 %v1167_v26 }
 0xaeb   :  { %v1169_v18 = vpop.xlane.xlu0 %1168 }
 0xaec   :  { %v1171_v34 = vperm.slane %v1169_v18, 0  ;;  %v1172_v38 = vperm.slane %v1169_v18, 1 }
 0xaee   :  { %v1175_v19 = vsub.f32 %v1153_v48, %v1171_v34  ;;  %v1176_v41 = vsub.f32 %v1154_v46, %v1172_v38  ;;  %v646_v48 = vperm.slane %v644_v9, 0  ;;  %v1067_v46 = vrot.slane %v1019_v22, 1 }
 0xaf0   :  { %v1177_v24 = vmul.f32 1.442695, %v1175_v19  ;;  %v1179_v35 = vmul.f32 1.442695, %v1176_v41  ;;  %v1069_v51 = vperm.slane %v1067_v46, 0 }
 0xaf2   :  { %1526 = vpow2.f32 %v1177_v24 }
 0xaf3   :  { %1528 = vpow2.f32 %v1179_v35 }
 0xaf8   :  { %v1527_v39 = vpop.eup %1526 }
 0xaf9   :  { %v1529_v36 = vpop.eup %1528  ;;  %1184 = vperm.xlu0 %1458, %v1527_v39  }
 0xafa   :  { %1187 = vperm.xlu2 %1457, %v1529_v36  }
 0xb54   :  { %v1188_v44 = vpop.permute.xlu2 %1187 }
 0xb55   :  { %v1190_v50 = vperm.slane %v1188_v44, %v1682_v37 }
 0xb6b   :  { %v1185_v49 = vpop.permute.xlu0 %1184 }
 0xb6c   :  { %v1189_v40 = vperm.slane %v1185_v49, %v1682_v37 }
 0xb6e   :  { %v1191_v52 = vsel %vm314_vm13, %v1190_v50, %v1189_v40 }
 0xb6f   :  { %v1193_v53 = vsel %vm317_vm14, %v1191_v52, 0.0 }
 0xb70   :  { %1194 = vadd.xlane.f32.xlu1 %v1193_v53 }
 0xbe3   :  { %v1195_v55 = vpop.xlane.xlu1 %1194 }
 0xbe4   :  { %v1197_v56 = vperm.slane %v1195_v55, 0  ;;  %v1198_v57 = vperm.slane %v1195_v55, 1 }
 0xbe6   :  { %1530 = vrcp.f32 %v1197_v56  ;;  %v1212_v45 = vand.u32 2147483648, %v1197_v56  ;;  %v1227_v63 = vand.u32 2147483648, %v1198_v57  ;;  %v1210_v37 = vand.u32 2147483647, %v1197_v56 }
 0xbe7   :  { %1532 = vrcp.f32 %v1198_v57  ;;  %v1225_v47 = vand.u32 2147483647, %v1198_v57  ;;  %vm1206_vm14 = vweird.f32 %v1197_v56  ;;  %vm1221_vm8 = vweird.f32 %v1198_v57 }
 0xbe8   :  { %v1213_v20 = vor.u32 1.1754944e-38, %v1212_v45  ;;  %v1228_v6 = vor.u32 1.1754944e-38, %v1227_v63  ;;  %vm1211_vm11 = vcmp.eq.f32.partialorder %v1210_v37, 8.507059e+37 }
 0xbe9   :  { %vm1226_vm12 = vcmp.eq.f32.partialorder %v1225_v47, 8.507059e+37 }
 0xbec   :  { %v1531_v58 = vpop.eup %1530 }
 0xbed   :  { %v1533_v60 = vpop.eup %1532  ;;  %v1202_v61 = vmul.f32 %v1531_v58, %v1197_v56  ;;  %vm1207_vm6 = vweird.f32 %v1531_v58 }
 0xbee   :  { %v1217_v62 = vmul.f32 %v1533_v60, %v1198_v57  ;;  %vm1222_vm7 = vweird.f32 %v1533_v60  ;;  %vm1208_vm9 = vmor %vm1206_vm14, %vm1207_vm6 }
 0xbef   :  { %v1203_v43 = vsub.f32 1.0, %v1202_v61  ;;  %vm1223_vm10 = vmor %vm1221_vm8, %vm1222_vm7 }
 0xbf0   :  { %v1218_v23 = vsub.f32 1.0, %v1217_v62 }
 0xbf1   :  { %v1204_v29 = vmul.f32 %v1531_v58, %v1203_v43 }
 0xbf2   :  { %v1219_v32 = vmul.f32 %v1533_v60, %v1218_v23  ;;  %v1344_v23 = vrot.slane %v1747_v17, 4 }
 0xbf3   :  { %v1205_v31 = vadd.f32 %v1531_v58, %v1204_v29 }
 0xbf4   :  { %v1220_v4 = vadd.f32 %v1533_v60, %v1219_v32 }
 0xbf5   :  { %v1209_v10 = vsel %vm1208_vm9, %v1531_v58, %v1205_v31  ;;  %v1322_v58 = vrot.slane %v1739_v7, 4 }
 0xbf6   :  { %v1224_v11 = vsel %vm1223_vm10, %v1533_v60, %v1220_v4  ;;  %v1214_v2 = vsel %vm1211_vm11, %v1213_v20, %v1209_v10 }
 0xbf7   :  { %v1229_v12 = vsel %vm1226_vm12, %v1228_v6, %v1224_v11  ;;  %v1215_v28 = vmul.f32 %v1527_v39, %v1214_v2 }
 0xbf8   :  { %v1230_v16 = vmul.f32 %v1529_v36, %v1229_v12  ;;  %v1366_v12 = vrot.slane %v1772_v0, 4 }
 0xbf9   :  { %1233 = vperm.xlu2 %1457, %v1215_v28  }
 0xbfa   :  { %1238 = vperm.xlu0 %1458, %v1230_v16  }
 0xc01   :  { %647 = vrot.lane.b32.xlu2 %v645_v21, %s1602_s13 }
 0xc02   :  { %649 = vrot.lane.b32.xlu0 %v646_v48, %s1602_s13 }
 0xc09   :  { %1070 = vrot.lane.b32.xlu2 %v1068_v13, %s1602_s13 }
 0xc0a   :  { %1072 = vrot.lane.b32.xlu0 %v1069_v51, %s1602_s13 }
 0xc53   :  { %v1234_v54 = vpop.permute.xlu2 %1233 }
 0xc54   :  { %v1241_v27 = vmul.f32 %v1234_v54, %v1892_v8 }
 0xc56   :  { %v1243_v33 = vsel %vm230_vm0, %v1241_v27, 0.0 }
 0xc57   :  { %v1244_v18 = vrot.slane %v1243_v33, 4 }
 0xc59   :  { %v1245_v34 = vadd.f32 %v1244_v18, %v1243_v33 }
 0xc5b   :  { %v648_v25 = vpop.permute.xlu2 %647  ;;  %v1246_v41 = vrot.slane %v1245_v34, 2 }
 0xc5c   :  { %654 = vst.msk [vmem:[%s1982_s4] sm:$0x1] %vm653_vm15, %v648_v25  ;;  %v1373_v25 = vrot.slane %v1867_v42, 4 }
 0xc5d   :  { %v1247_v39 = vadd.f32 %v1246_v41, %v1245_v34 }
 0xc5f   :  { %v1248_v49 = vrot.slane %v1247_v39, 1 }
 0xc61   :  { %v1249_v52 = vadd.f32 %v1248_v49, %v1247_v39 }
 0xc63   :  { %v1071_v26 = vpop.permute.xlu2 %1070 }
 0xc64   :  { %1076 = vst.msk [vmem:[%s1982_s4 + $0x1] sm:$0x1] %vm653_vm15, %v1071_v26 }
 0xc6c   :  { %v1239_v38 = vpop.permute.xlu0 %1238 }
 0xc6d   :  { %v1242_v19 = vmul.f32 %v1239_v38, %v1898_v30 }
 0xc6f   :  { %v1250_v24 = vsel %vm230_vm0, %v1242_v19, 0.0 }
 0xc70   :  { %v1251_v35 = vrot.slane %v1250_v24, 4 }
 0xc72   :  { %v1252_v36 = vadd.f32 %v1251_v35, %v1250_v24 }
 0xc74   :  { %v1253_v8 = vrot.slane %v1252_v36, 2  ;;  %v650_v44 = vpop.permute.xlu0 %649 }
 0xc75   :  { %655 = vst.msk [vmem:[%s1982_s4 + $0x4] sm:$0x1] %vm653_vm15, %v650_v44 }
 0xc76   :  { %v1254_v50 = vadd.f32 %v1253_v8, %v1252_v36 }
 0xc78   :  { %v1255_v40 = vrot.slane %v1254_v50, 1 }
 0xc7a   :  { %v1256_v53 = vadd.f32 %v1255_v40, %v1254_v50 }
 0xc7c   :  { %v1073_v55 = vpop.permute.xlu0 %1072  ;;  %v1259_v30 = vsel %vm314_vm13, %v1256_v53, %v1249_v52 }
 0xc7d   :  { %1077 = vst.msk [vmem:[%s1982_s4 + $0x5] sm:$0x1] %vm653_vm15, %v1073_v55  ;;  %1445 = vmatmul.msk.f32.vlgmr.msra.gmra.mxu1 %vm230_vm0, %v1259_v30  ;;  %1446 = vmatmul.msk.f32.vlgmr.msra.gmra.mxu2 %vm230_vm0, %v1259_v30 }
 0xc7e   :  { %1447 = vmatmul.msk.f32.vlgmr.msra.gmra.mxu3 %vm230_vm0, %v1259_v30 }
 0xcfa   :  { %v1279_v56 = vpop.f32.mrf.mxu1 }
 0xcfb   :  { %v1280_v57 = vadd.f32 %v1279_v56, %v1736_v5 }
 0xcfd   :  { %v1324_v60 = vadd.f32 %v1322_v58, %v1280_v57 }
 0xcff   :  { %v1448_v61 = vmul.f32 -1.442695, %v1324_v60 }
 0xd00   :  { %v1299_v62 = vpop.f32.mrf.mxu2 }
 0xd01   :  { %1534 = vpow2.f32 %v1448_v61  ;;  %v1300_v43 = vadd.f32 %v1299_v62, %v1745_v14  ;;  %v1319_v11 = vpop.f32.mrf.mxu3 }
 0xd02   :  { %v1320_v16 = vadd.f32 %v1319_v11, %v1769_v59 }
 0xd03   :  { %v1346_v45 = vadd.f32 %v1344_v23, %v1300_v43 }
 0xd05   :  { %v1449_v63 = vmul.f32 -1.442695, %v1346_v45 }
 0xd07   :  { %v1535_v29 = vpop.eup %1534  ;;  %1536 = vpow2.f32 %v1449_v63 }
 0xd08   :  { %v1328_v37 = vadd.f32 1.0, %v1535_v29 }
 0xd0a   :  { %1538 = vrcp.f32 %v1328_v37  ;;  %v1340_v4 = vand.u32 2147483648, %v1328_v37  ;;  %v1338_v6 = vand.u32 2147483647, %v1328_v37  ;;  %vm1334_vm13 = vweird.f32 %v1328_v37 }
 0xd0c   :  { %v1341_v2 = vor.u32 1.1754944e-38, %v1340_v4  ;;  %vm1339_vm3 = vcmp.eq.f32.partialorder %v1338_v6, 8.507059e+37 }
 0xd0d   :  { %v1537_v32 = vpop.eup %1536 }
 0xd0e   :  { %v1350_v47 = vadd.f32 1.0, %v1537_v32 }
 0xd10   :  { %v1539_v31 = vpop.eup %1538  ;;  %1540 = vrcp.f32 %v1350_v47  ;;  %v1362_v21 = vand.u32 2147483648, %v1350_v47  ;;  %v1360_v22 = vand.u32 2147483647, %v1350_v47  ;;  %vm1356_vm6 = vweird.f32 %v1350_v47 }
 0xd11   :  { %v1330_v5 = vmul.f32 %v1539_v31, %v1328_v37  ;;  %vm1335_vm0 = vweird.f32 %v1539_v31 }
 0xd12   :  { %vm1336_vm2 = vmor %vm1334_vm13, %vm1335_vm0  ;;  %v1363_v54 = vor.u32 1.1754944e-38, %v1362_v21  ;;  %vm1361_vm14 = vcmp.eq.f32.partialorder %v1360_v22, 8.507059e+37 }
 0xd13   :  { %v1331_v7 = vsub.f32 1.0, %v1330_v5 }
 0xd15   :  { %v1332_v20 = vmul.f32 %v1539_v31, %v1331_v7 }
 0xd16   :  { %v1541_v10 = vpop.eup %1540 }
 0xd17   :  { %v1352_v14 = vmul.f32 %v1541_v10, %v1350_v47  ;;  %v1333_v17 = vadd.f32 %v1539_v31, %v1332_v20  ;;  %vm1357_vm4 = vweird.f32 %v1541_v10 }
 0xd18   :  { %vm1358_vm7 = vmor %vm1356_vm6, %vm1357_vm4 }
 0xd19   :  { %v1353_v28 = vsub.f32 1.0, %v1352_v14  ;;  %v1337_v15 = vsel %vm1336_vm2, %v1539_v31, %v1333_v17 }
 0xd1a   :  { %v1342_v9 = vsel %vm1339_vm3, %v1341_v2, %v1337_v15 }
 0xd1b   :  { %v1354_v3 = vmul.f32 %v1541_v10, %v1353_v28  ;;  %v1368_v48 = vmul.f32 %v1366_v12, %v1342_v9 }
 0xd1d   :  { %v1355_v46 = vadd.f32 %v1541_v10, %v1354_v3  ;;  %v1369_v13 = vadd.f32 %v1368_v48, %v1320_v16 }
 0xd1f   :  { %v1359_v51 = vsel %vm1358_vm7, %v1541_v10, %v1355_v46  ;;  %1542 = vtanh.f32 %v1369_v13 }
 0xd20   :  { %v1364_v0 = vsel %vm1361_vm14, %v1363_v54, %v1359_v51 }
 0xd21   :  { %v1371_v27 = vsub.f32 1.0, %v1364_v0  ;;  %v1375_v26 = vmul.f32 %v1373_v25, %v1364_v0 }
 0xd25   :  { %v1543_v33 = vpop.eup %1542 }
 0xd26   :  { %v1372_v59 = vmul.f32 %v1543_v33, %v1371_v27 }
 0xd28   :  { %v1376_v18 = vadd.f32 %v1375_v26, %v1372_v59 }
 0xd2a   :  { %1450 = vmatmul.msk.f32.vlgmr.msrb.gmra.mxu0 %vm80_vm1, %v1376_v18  ;;  %1402 = vst.msk [vmem:[%s1982_s4 + $0x2] sm:$0x1] %vm640_vm5, %v1376_v18  ;;  %v1400_v34 = vrot.slane %v1376_v18, 1 }
 0xd2c   :  { %1403 = vst.msk [vmem:[%s1982_s4 + $0x6] sm:$0x1] %vm640_vm5, %v1400_v34 }
 0xda7   :  { %v1397_v38 = vpop.f32.mrf.mxu0 }
 0xda8   :  { %v1398_v42 = vadd.f32 %v1397_v38, %v1918_v1 }
 0xdaa   :  { %v1405_v19 = vrot.slane %v1398_v42, 1  ;;  %v1406_v41 = vperm.slane %v1398_v42, 0 }
 0xdac   :  { %v1407_v24 = vperm.slane %v1405_v19, 0  ;;  %1408 = vrot.lane.b32.xlu2 %v1406_v41, %s1602_s13 }
 0xdae   :  { %1410 = vrot.lane.b32.xlu0 %v1407_v24, %s1602_s13 }
 0xe06   :  { %v1409_v35 = vpop.permute.xlu2 %1408 }
 0xe07   :  { %1414 = vst.msk [vmem:[%s1982_s4 + $0x2] sm:$0x1] %vm653_vm15, %v1409_v35 }
 0xe20   :  { %v1411_v39 = vpop.permute.xlu0 %1410 }
 0xe21   :  { %1415 = vst.msk [vmem:[%s1982_s4 + $0x6] sm:$0x1] %vm653_vm15, %v1411_v39 }
 0xe22   :  { %1420 = vsyncpa [#allocation3], 1 }
 0xe23   :  { %1421 = vsyncpa [#allocation5], 1 }

</bundles_post_ra>
